<compile_context>
chip_gen: v5e
topology: v5e:2x2
jax: 0.10.0
libtpu: 0.0.40
codegen_flags: <defaults>
</compile_context>

<pallas_src>
import functools

import jax
import jax.numpy as jnp
from jax.experimental import pallas as pl
from jax.experimental.pallas import tpu as pltpu


# ----------------------------------------------------------------------------
# in-kernel building blocks (traced inline inside the fused kernel)
# ----------------------------------------------------------------------------

def _attention(qp, kp, vp, mask, wo_ref, bo_ref, *, bb, lq, lk, n_head):
    """Attention core on already-projected q/k/v.

    qp: (bb*lq, H) f32   kp, vp: (bb*lk, H) f32   mask: (bb, lq, lk), 1=attend.
    wo_ref: (H, H) bf16  bo_ref: (1, H) f32.
    Returns (bb*lq, H) f32.
    """
    hidden = qp.shape[-1]
    dh = hidden // n_head
    scale = float(dh) ** -0.5

    q3 = qp.reshape(bb, lq, hidden).astype(jnp.bfloat16)
    k3 = kp.reshape(bb, lk, hidden).astype(jnp.bfloat16)
    v3 = vp.reshape(bb, lk, hidden).astype(jnp.bfloat16)

    # Additive mask penalty, computed once per attention (hoisted out of the
    # head loop); matches the PyTorch "y - 10000 * (mask == 0)".
    neg = jnp.where(mask == 0.0, -10000.0, 0.0)              # (bb, lq, lk) f32

    heads = []
    # TODO(synk): at larger n_head fold the head axis into the einsum batch dim
    # ('(b h) q d'); kept as a static unroll here to avoid 4-D transposes at
    # this tiny d_head.
    for h in range(n_head):
        sl = slice(h * dh, (h + 1) * dh)
        s = jnp.einsum("bqd,bkd->bqk", q3[:, :, sl], k3[:, :, sl],
                       preferred_element_type=jnp.float32) * scale
        s = s + neg
        s = s - jnp.max(s, axis=-1, keepdims=True)
        p = jnp.exp(s)
        p = p * pl.reciprocal(jnp.sum(p, axis=-1, keepdims=True), approx=True)
        heads.append(jnp.einsum("bqk,bkd->bqd",
                                p.astype(jnp.bfloat16), v3[:, :, sl],
                                preferred_element_type=jnp.float32))

    ctx = jnp.concatenate(heads, axis=-1).reshape(bb * lq, hidden)   # (M, H)
    # Single output projection: MXU accumulates over heads internally.
    return jnp.dot(ctx.astype(jnp.bfloat16), wo_ref[...],
                   preferred_element_type=jnp.float32) + bo_ref[...]


def _add_layernorm(x, res, g, b, eps):
    """LayerNorm(x + res), PyTorch semantics (biased variance, eps inside rsqrt)."""
    y = x + res
    mean = jnp.mean(y, axis=-1, keepdims=True)
    var = jnp.mean((y - mean) ** 2, axis=-1, keepdims=True)
    return (y - mean) * jax.lax.rsqrt(var + eps) * g + b


# ----------------------------------------------------------------------------
# fused decoder-layer kernel (one grid step == one block of batch elements)
# ----------------------------------------------------------------------------

def _make_decoder_layer_kernel(*, n_head, eps, has_cross, block_b,
                               trg_len, src_len, hidden):
    H = hidden

    def kernel(*refs):
        if has_cross:
            (dec_ref, enc_ref, trg_m_ref, src_m_ref,
             sa_wqkv_ref, sa_bqkv_ref, sa_wo_ref, sa_bo_ref,
             ca_wq_ref, ca_bq_ref, ca_wkv_ref, ca_bkv_ref, ca_wo_ref, ca_bo_ref,
             w1_ref, b1_ref, w2_ref, b2_ref, ln_ref, out_ref) = refs
        else:
            (dec_ref, trg_m_ref,
             sa_wqkv_ref, sa_bqkv_ref, sa_wo_ref, sa_bo_ref,
             w1_ref, b1_ref, w2_ref, b2_ref, ln_ref, out_ref) = refs

        # Flatten batch*seq into the matmul M dimension.
        dec = dec_ref[...].reshape(block_b * trg_len, H)          # (M, H) f32

        # --- masked self-attention (fused QKV) + dropout(identity) + add&norm
        qkv = jnp.dot(dec.astype(jnp.bfloat16), sa_wqkv_ref[...],
                      preferred_element_type=jnp.float32) + sa_bqkv_ref[...]
        a = _attention(qkv[:, :H], qkv[:, H:2 * H], qkv[:, 2 * H:],
                       trg_m_ref[...], sa_wo_ref, sa_bo_ref,
                       bb=block_b, lq=trg_len, lk=trg_len, n_head=n_head)
        x = _add_layernorm(a, dec, ln_ref[0:1, :], ln_ref[1:2, :], eps)

        # --- encoder-decoder cross-attention + add & norm --------------------
        if has_cross:                           # static; mirrors `if enc is not None`
            enc = enc_ref[...].reshape(block_b * src_len, H)
            q = jnp.dot(x.astype(jnp.bfloat16), ca_wq_ref[...],
                        preferred_element_type=jnp.float32) + ca_bq_ref[...]
            kv = jnp.dot(enc.astype(jnp.bfloat16), ca_wkv_ref[...],
                         preferred_element_type=jnp.float32) + ca_bkv_ref[...]
            a = _attention(q, kv[:, :H], kv[:, H:],
                           src_m_ref[...], ca_wo_ref, ca_bo_ref,
                           bb=block_b, lq=trg_len, lk=src_len, n_head=n_head)
            x = _add_layernorm(a, x, ln_ref[2:3, :], ln_ref[3:4, :], eps)

        # --- position-wise FFN (ReLU) + add & norm ----------------------------
        h1 = jnp.dot(x.astype(jnp.bfloat16), w1_ref[...],
                     preferred_element_type=jnp.float32) + b1_ref[...]
        h1 = jnp.maximum(h1, 0.0)
        f = jnp.dot(h1.astype(jnp.bfloat16), w2_ref[...],
                    preferred_element_type=jnp.float32) + b2_ref[...]
        x = _add_layernorm(f, x, ln_ref[4:5, :], ln_ref[5:6, :], eps)

        out_ref[...] = x.reshape(block_b, trg_len, H).astype(out_ref.dtype)

    return kernel


# ----------------------------------------------------------------------------
# wrapper: weight re-layout + single pallas_call
# ----------------------------------------------------------------------------

def _pick_block_b(batch, seq):
    """Largest divisor of `batch` with block_b*seq <= 512 (fills MXU rows)."""
    best = 1
    for cand in range(1, batch + 1):
        if batch % cand == 0 and cand * seq <= 512:
            best = cand
    return best


def decoder_layer_forward(params, dec, enc, trg_mask, src_mask, *, n_head, eps=1e-5):
    B, T, H = dec.shape
    assert H % n_head == 0
    has_cross = enc is not None
    S = enc.shape[1] if has_cross else T

    block_b = _pick_block_b(B, T)
    grid = (B // block_b,)

    def to_mask(m, Lq, Lk):
        """Any mask broadcastable to (B, 1, Lq, Lk) -> (B, Lq, Lk) f32, 1=attend."""
        if m is None:
            return jnp.ones((B, Lq, Lk), jnp.float32)
        m = m.astype(jnp.float32)
        m = m.reshape((1,) * (4 - m.ndim) + m.shape)
        return jnp.broadcast_to(m, (B, 1, Lq, Lk))[:, 0]

    trg_m = to_mask(trg_mask, T, T)

    wdt = jnp.bfloat16        # MXU-operand dtype; halves weight DMA / VMEM bytes
    sa = params["self_attn"]
    sa_wqkv = jnp.concatenate([sa["w_q"], sa["w_k"], sa["w_v"]], axis=1).astype(wdt)
    sa_bqkv = jnp.concatenate([sa["b_q"], sa["b_k"], sa["b_v"]]
                              ).reshape(1, 3 * H).astype(jnp.float32)
    sa_wo = sa["w_o"].astype(wdt)
    sa_bo = sa["b_o"].reshape(1, H).astype(jnp.float32)

    w1 = params["ffn_w1"].astype(wdt)
    b1 = params["ffn_b1"].reshape(1, -1).astype(jnp.float32)
    w2 = params["ffn_w2"].astype(wdt)
    b2 = params["ffn_b2"].reshape(1, -1).astype(jnp.float32)
    ln = jnp.stack([params["ln1_g"], params["ln1_b"],
                    params["ln2_g"], params["ln2_b"],
                    params["ln3_g"], params["ln3_b"]], axis=0).astype(jnp.float32)

    def bspec(trailing):                       # batch-blocked activations / masks
        nd = len(trailing)
        return pl.BlockSpec((block_b,) + trailing,
                            lambda i, _nd=nd: (i,) + (0,) * _nd)

    def wspec(shape):                          # grid-invariant weights: single buffer
        nd = len(shape)
        idx = lambda i, _nd=nd: (0,) * _nd
        try:
            return pl.BlockSpec(shape, idx, pipeline_mode=pl.Buffered(1))
        except (TypeError, AttributeError):    # older jax without pipeline_mode
            return pl.BlockSpec(shape, idx)

    if has_cross:
        src_m = to_mask(src_mask, T, S)
        ca = params["cross_attn"]
        ca_wq = ca["w_q"].astype(wdt)
        ca_bq = ca["b_q"].reshape(1, H).astype(jnp.float32)
        ca_wkv = jnp.concatenate([ca["w_k"], ca["w_v"]], axis=1).astype(wdt)
        ca_bkv = jnp.concatenate([ca["b_k"], ca["b_v"]]
                                 ).reshape(1, 2 * H).astype(jnp.float32)
        ca_wo = ca["w_o"].astype(wdt)
        ca_bo = ca["b_o"].reshape(1, H).astype(jnp.float32)
        act_args = [dec, enc, trg_m, src_m]
        act_specs = [bspec((T, H)), bspec((S, H)), bspec((T, T)), bspec((T, S))]
        cross_ops = [ca_wq, ca_bq, ca_wkv, ca_bkv, ca_wo, ca_bo]
    else:
        act_args = [dec, trg_m]
        act_specs = [bspec((T, H)), bspec((T, T))]
        cross_ops = []

    weight_ops = [sa_wqkv, sa_bqkv, sa_wo, sa_bo] + cross_ops + [w1, b1, w2, b2, ln]
    args = act_args + weight_ops
    in_specs = act_specs + [wspec(w.shape) for w in weight_ops]

    kernel = _make_decoder_layer_kernel(n_head=n_head, eps=eps, has_cross=has_cross,
                                        block_b=block_b, trg_len=T, src_len=S,
                                        hidden=H)

    return pl.pallas_call(
        kernel,
        out_shape=jax.ShapeDtypeStruct((B, T, H), jnp.float32),
        grid=grid,
        in_specs=in_specs,
        out_specs=pl.BlockSpec((block_b, T, H), lambda i: (i, 0, 0)),
        compiler_params=pltpu.CompilerParams(dimension_semantics=("parallel",)),
    )(*args)


# ----------------------------------------------------------------------------
# pure-JAX reference (mirrors the PyTorch module) for a correctness self-check
# ----------------------------------------------------------------------------

def _reference_decoder_layer(params, dec, enc, trg_mask, src_mask, *, n_head, eps=1e-5):
    def attention(ap, q_in, k_in, v_in, mask):
        B, Lq, H = q_in.shape
        Lk = v_in.shape[1]
        dh = H // n_head
        q = q_in @ ap["w_q"] + ap["b_q"]
        k = v_in @ ap["w_k"] + ap["b_k"]          # quirk: w_k applied to v
        v = v_in @ ap["w_v"] + ap["b_v"]
        q = q.reshape(B, Lq, n_head, dh).transpose(0, 2, 1, 3)
        k = k.reshape(B, Lk, n_head, dh).transpose(0, 2, 1, 3)
        v = v.reshape(B, Lk, n_head, dh).transpose(0, 2, 1, 3)
        s = (q @ k.transpose(0, 1, 3, 2)) * dh ** -0.5
        if mask is not None:
            s = s - 10000.0 * (mask == 0)
        a = jax.nn.softmax(s, axis=-1)
        y = (a @ v).transpose(0, 2, 1, 3).reshape(B, Lq, H)
        return y @ ap["w_o"] + ap["b_o"]

    def layernorm(x, g, b):
        mu = x.mean(-1, keepdims=True)
        var = ((x - mu) ** 2).mean(-1, keepdims=True)
        return (x - mu) * jax.lax.rsqrt(var + eps) * g + b

    x = layernorm(attention(params["self_attn"], dec, dec, dec, trg_mask) + dec,
                  params["ln1_g"], params["ln1_b"])
    if enc is not None:
        x = layernorm(attention(params["cross_attn"], x, enc, enc, src_mask) + x,
                      params["ln2_g"], params["ln2_b"])
    h = jnp.maximum(x @ params["ffn_w1"] + params["ffn_b1"], 0.0)
    f = h @ params["ffn_w2"] + params["ffn_b2"]
    return layernorm(f + x, params["ln3_g"], params["ln3_b"])


# ----------------------------------------------------------------------------
# parameter init (nn.Linear-style; weights stored as (in_features, out_features))
# ----------------------------------------------------------------------------

def init_decoder_layer_params(key, hidden, ffn_hidden):
    def linear_init(k, fan_in, fan_out):
        kw, kb = jax.random.split(k)
        bound = 1.0 / float(fan_in) ** 0.5
        w = jax.random.uniform(kw, (fan_in, fan_out), jnp.float32, -bound, bound)
        b = jax.random.uniform(kb, (fan_out,), jnp.float32, -bound, bound)
        return w, b

    def attn_init(k):
        ks = jax.random.split(k, 4)
        p = {}
        for name, kk in zip(("q", "k", "v", "o"), ks):
            w, b = linear_init(kk, hidden, hidden)
            p[f"w_{name}"] = w
            p[f"b_{name}"] = b
        return p

    k_sa, k_ca, k_f1, k_f2, k_ln = jax.random.split(key, 5)
    w1, b1 = linear_init(k_f1, hidden, ffn_hidden)
    w2, b2 = linear_init(k_f2, ffn_hidden, hidden)
    params = {
        "self_attn": attn_init(k_sa),
        "cross_attn": attn_init(k_ca),
        "ffn_w1": w1, "ffn_b1": b1, "ffn_w2": w2, "ffn_b2": b2,
    }
    ln_keys = jax.random.split(k_ln, 6)
    for i, name in enumerate(("ln1", "ln2", "ln3")):
        params[f"{name}_g"] = 1.0 + 0.1 * jax.random.normal(
            ln_keys[2 * i], (hidden,), jnp.float32)
        params[f"{name}_b"] = 0.1 * jax.random.normal(
            ln_keys[2 * i + 1], (hidden,), jnp.float32)
    return params


# ----------------------------------------------------------------------------
# main
# ----------------------------------------------------------------------------

if __name__ == "__main__":
    HIDDEN, FFN_HIDDEN, N_HEAD = 32, 64, 4
    BATCH, TRG_LEN, SRC_LEN = 2, 8, 8
    PAD_IDX = 1

    root = jax.random.PRNGKey(0)
    kp, kd, ke, ks, kt = jax.random.split(root, 5)

    params = init_decoder_layer_params(kp, HIDDEN, FFN_HIDDEN)
    dec = jax.random.normal(kd, (BATCH, TRG_LEN, HIDDEN), jnp.float32)
    enc = jax.random.normal(ke, (BATCH, SRC_LEN, HIDDEN), jnp.float32)

    # transformer-style masks (1 = attend, 0 = masked), with some padding tokens
    src_tokens = jax.random.randint(ks, (BATCH, SRC_LEN), 2, 16, dtype=jnp.int32)
    trg_tokens = jax.random.randint(kt, (BATCH, TRG_LEN), 2, 16, dtype=jnp.int32)
    src_tokens = src_tokens.at[0, -2:].set(PAD_IDX)
    trg_tokens = trg_tokens.at[1, -1:].set(PAD_IDX)
    src_mask = (src_tokens != PAD_IDX)[:, None, None, :]                  # (B,1,1,S)
    trg_mask = ((trg_tokens != PAD_IDX)[:, None, None, :]
                & jnp.tril(jnp.ones((TRG_LEN, TRG_LEN), dtype=bool)))     # (B,1,T,T)

    fwd = jax.jit(functools.partial(decoder_layer_forward, n_head=N_HEAD))
    out = fwd(params, dec, enc, trg_mask, src_mask)
    jax.block_until_ready(out)

    ref = _reference_decoder_layer(params, dec, enc, trg_mask, src_mask,
                                   n_head=N_HEAD)

    assert out.shape == (BATCH, TRG_LEN, HIDDEN)
    assert bool(jnp.all(jnp.isfinite(out)))
    # Tolerance covers bf16 MXU operands + approx-reciprocal softmax vs the f32
    # reference; structural errors would produce O(1) deviations on the
    # LayerNorm-scaled outputs.
    assert float(jnp.max(jnp.abs(out - ref))) < 2e-1
    print("KERNEL_OK")
</pallas_src>

<mosaic_0001>
module attributes {stable_mosaic.version = 11 : i64} {
  func.func @kernel(%arg0: i32, %arg1: memref<2x8x32xf32, #tpu.memory_space<vmem>>, %arg2: memref<2x8x32xf32, #tpu.memory_space<vmem>>, %arg3: memref<2x8x8xf32, #tpu.memory_space<vmem>>, %arg4: memref<2x8x8xf32, #tpu.memory_space<vmem>>, %arg5: memref<32x96xbf16, #tpu.memory_space<vmem>>, %arg6: memref<1x96xf32, #tpu.memory_space<vmem>>, %arg7: memref<32x32xbf16, #tpu.memory_space<vmem>>, %arg8: memref<1x32xf32, #tpu.memory_space<vmem>>, %arg9: memref<32x32xbf16, #tpu.memory_space<vmem>>, %arg10: memref<1x32xf32, #tpu.memory_space<vmem>>, %arg11: memref<32x64xbf16, #tpu.memory_space<vmem>>, %arg12: memref<1x64xf32, #tpu.memory_space<vmem>>, %arg13: memref<32x32xbf16, #tpu.memory_space<vmem>>, %arg14: memref<1x32xf32, #tpu.memory_space<vmem>>, %arg15: memref<32x64xbf16, #tpu.memory_space<vmem>>, %arg16: memref<1x64xf32, #tpu.memory_space<vmem>>, %arg17: memref<64x32xbf16, #tpu.memory_space<vmem>>, %arg18: memref<1x32xf32, #tpu.memory_space<vmem>>, %arg19: memref<6x32xf32, #tpu.memory_space<vmem>>, %arg20: memref<2x8x32xf32, #tpu.memory_space<vmem>>) attributes {dimension_semantics = [#tpu.dimension_semantics<parallel>], iteration_bounds = array<i64: 1>, scalar_prefetch = 0 : i64, scratch_operands = 0 : i64, tpu.core_type = #tpu.core_type<tc>, window_params = [{transform_indices = @transform_0, window_bounds = array<i64: 2, 8, 32>}, {transform_indices = @transform_1, window_bounds = array<i64: 2, 8, 32>}, {transform_indices = @transform_2, window_bounds = array<i64: 2, 8, 8>}, {transform_indices = @transform_3, window_bounds = array<i64: 2, 8, 8>}, {pipeline_mode = #tpu.pipeline_mode<synchronous>, transform_indices = @transform_4, window_bounds = array<i64: 32, 96>}, {pipeline_mode = #tpu.pipeline_mode<synchronous>, transform_indices = @transform_5, window_bounds = array<i64: 1, 96>}, {pipeline_mode = #tpu.pipeline_mode<synchronous>, transform_indices = @transform_6, window_bounds = array<i64: 32, 32>}, {pipeline_mode = #tpu.pipeline_mode<synchronous>, transform_indices = @transform_7, window_bounds = array<i64: 1, 32>}, {pipeline_mode = #tpu.pipeline_mode<synchronous>, transform_indices = @transform_8, window_bounds = array<i64: 32, 32>}, {pipeline_mode = #tpu.pipeline_mode<synchronous>, transform_indices = @transform_9, window_bounds = array<i64: 1, 32>}, {pipeline_mode = #tpu.pipeline_mode<synchronous>, transform_indices = @transform_10, window_bounds = array<i64: 32, 64>}, {pipeline_mode = #tpu.pipeline_mode<synchronous>, transform_indices = @transform_11, window_bounds = array<i64: 1, 64>}, {pipeline_mode = #tpu.pipeline_mode<synchronous>, transform_indices = @transform_12, window_bounds = array<i64: 32, 32>}, {pipeline_mode = #tpu.pipeline_mode<synchronous>, transform_indices = @transform_13, window_bounds = array<i64: 1, 32>}, {pipeline_mode = #tpu.pipeline_mode<synchronous>, transform_indices = @transform_14, window_bounds = array<i64: 32, 64>}, {pipeline_mode = #tpu.pipeline_mode<synchronous>, transform_indices = @transform_15, window_bounds = array<i64: 1, 64>}, {pipeline_mode = #tpu.pipeline_mode<synchronous>, transform_indices = @transform_16, window_bounds = array<i64: 64, 32>}, {pipeline_mode = #tpu.pipeline_mode<synchronous>, transform_indices = @transform_17, window_bounds = array<i64: 1, 32>}, {pipeline_mode = #tpu.pipeline_mode<synchronous>, transform_indices = @transform_18, window_bounds = array<i64: 6, 32>}, {transform_indices = @transform_19, window_bounds = array<i64: 2, 8, 32>}]} {
    %c0 = arith.constant 0 : index
    %c0_0 = arith.constant 0 : index
    %c0_1 = arith.constant 0 : index
    %0 = vector.load %arg1[%c0, %c0_0, %c0_1] : memref<2x8x32xf32, #tpu.memory_space<vmem>>, vector<2x8x32xf32>
    %1 = vector.shape_cast %0 : vector<2x8x32xf32> to vector<16x32xf32>
    %2 = arith.truncf %1 : vector<16x32xf32> to vector<16x32xbf16>
    %c0_2 = arith.constant 0 : index
    %c0_3 = arith.constant 0 : index
    %3 = vector.load %arg5[%c0_2, %c0_3] : memref<32x96xbf16, #tpu.memory_space<vmem>>, vector<32x96xbf16>
    %cst = arith.constant dense<0.000000e+00> : vector<16x96xf32>
    %4 = tpu.matmul %2, %3, %cst {dimension_numbers = #tpu.dot_dimension_numbers<[1], [0], [0], [1], [0, 0, 1, 1], [], []>} : vector<16x32xbf16>, vector<32x96xbf16>, vector<16x96xf32> -> vector<16x96xf32>
    %c0_4 = arith.constant 0 : index
    %c0_5 = arith.constant 0 : index
    %5 = vector.load %arg6[%c0_4, %c0_5] : memref<1x96xf32, #tpu.memory_space<vmem>>, vector<1x96xf32>
    %6 = vector.broadcast %5 : vector<1x96xf32> to vector<16x96xf32>
    %7 = arith.addf %4, %6 : vector<16x96xf32>
    %8 = vector.extract_strided_slice %7 {offsets = [0, 0], sizes = [16, 32], strides = [1, 1]} : vector<16x96xf32> to vector<16x32xf32>
    %9 = vector.extract_strided_slice %7 {offsets = [0, 32], sizes = [16, 32], strides = [1, 1]} : vector<16x96xf32> to vector<16x32xf32>
    %10 = vector.extract_strided_slice %7 {offsets = [0, 64], sizes = [16, 32], strides = [1, 1]} : vector<16x96xf32> to vector<16x32xf32>
    %c0_6 = arith.constant 0 : index
    %c0_7 = arith.constant 0 : index
    %c0_8 = arith.constant 0 : index
    %11 = vector.load %arg3[%c0_6, %c0_7, %c0_8] : memref<2x8x8xf32, #tpu.memory_space<vmem>>, vector<2x8x8xf32>
    %12 = vector.shape_cast %8 : vector<16x32xf32> to vector<2x8x32xf32>
    %13 = arith.truncf %12 : vector<2x8x32xf32> to vector<2x8x32xbf16>
    %14 = vector.shape_cast %9 : vector<16x32xf32> to vector<2x8x32xf32>
    %15 = arith.truncf %14 : vector<2x8x32xf32> to vector<2x8x32xbf16>
    %16 = vector.shape_cast %10 : vector<16x32xf32> to vector<2x8x32xf32>
    %17 = arith.truncf %16 : vector<2x8x32xf32> to vector<2x8x32xbf16>
    %cst_9 = arith.constant 0.000000e+00 : f32
    %18 = vector.broadcast %cst_9 : f32 to vector<2x8x8xf32>
    %19 = arith.cmpf oeq, %11, %18 : vector<2x8x8xf32>
    %cst_10 = arith.constant -1.000000e+04 : f32
    %cst_11 = arith.constant 0.000000e+00 : f32
    %20 = vector.broadcast %cst_10 : f32 to vector<2x8x8xf32>
    %21 = vector.broadcast %cst_11 : f32 to vector<2x8x8xf32>
    %22 = arith.select %19, %20, %21 : vector<2x8x8xi1>, vector<2x8x8xf32>
    %23 = vector.extract_strided_slice %13 {offsets = [0, 0, 0], sizes = [2, 8, 8], strides = [1, 1, 1]} : vector<2x8x32xbf16> to vector<2x8x8xbf16>
    %24 = vector.extract_strided_slice %15 {offsets = [0, 0, 0], sizes = [2, 8, 8], strides = [1, 1, 1]} : vector<2x8x32xbf16> to vector<2x8x8xbf16>
    "tpu.trace_start"() <{level = 10 : i32, message = "bqd,bkd->bqk"}> : () -> ()
    %cst_12 = arith.constant dense<0.000000e+00> : vector<2x8x8xf32>
    %25 = tpu.matmul %23, %24, %cst_12 {dimension_numbers = #tpu.dot_dimension_numbers<[2], [2], [1], [1], [0, 0, 0, 1, 1, 1], [0], [0]>} : vector<2x8x8xbf16>, vector<2x8x8xbf16>, vector<2x8x8xf32> -> vector<2x8x8xf32>
    "tpu.trace_stop"() : () -> ()
    %cst_13 = arith.constant 0.353553385 : f32
    %26 = vector.broadcast %cst_13 : f32 to vector<2x8x8xf32>
    %27 = arith.mulf %25, %26 : vector<2x8x8xf32>
    %28 = arith.addf %27, %22 : vector<2x8x8xf32>
    %cst_14 = arith.constant dense<0xFF800000> : vector<2x8xf32>
    %29 = vector.multi_reduction <maximumf>, %28, %cst_14 [2] : vector<2x8x8xf32> to vector<2x8xf32>
    %30 = vector.shape_cast %29 : vector<2x8xf32> to vector<2x8x1xf32>
    %31 = vector.broadcast %30 : vector<2x8x1xf32> to vector<2x8x8xf32>
    %32 = arith.subf %28, %31 : vector<2x8x8xf32>
    %33 = math.exp %32 : vector<2x8x8xf32>
    %cst_15 = arith.constant dense<0.000000e+00> : vector<2x8xf32>
    %34 = vector.multi_reduction <add>, %33, %cst_15 [2] : vector<2x8x8xf32> to vector<2x8xf32>
    %35 = vector.shape_cast %34 : vector<2x8xf32> to vector<2x8x1xf32>
    %36 = tpu.reciprocal %35 {approx = true} : vector<2x8x1xf32> -> vector<2x8x1xf32>
    %37 = vector.broadcast %36 : vector<2x8x1xf32> to vector<2x8x8xf32>
    %38 = arith.mulf %33, %37 : vector<2x8x8xf32>
    %39 = arith.truncf %38 : vector<2x8x8xf32> to vector<2x8x8xbf16>
    %40 = vector.extract_strided_slice %17 {offsets = [0, 0, 0], sizes = [2, 8, 8], strides = [1, 1, 1]} : vector<2x8x32xbf16> to vector<2x8x8xbf16>
    "tpu.trace_start"() <{level = 10 : i32, message = "bqk,bkd->bqd"}> : () -> ()
    %cst_16 = arith.constant dense<0.000000e+00> : vector<2x8x8xf32>
    %41 = tpu.matmul %39, %40, %cst_16 {dimension_numbers = #tpu.dot_dimension_numbers<[2], [1], [1], [2], [0, 0, 0, 1, 1, 2], [0], [0]>} : vector<2x8x8xbf16>, vector<2x8x8xbf16>, vector<2x8x8xf32> -> vector<2x8x8xf32>
    "tpu.trace_stop"() : () -> ()
    %42 = vector.extract_strided_slice %13 {offsets = [0, 0, 8], sizes = [2, 8, 8], strides = [1, 1, 1]} : vector<2x8x32xbf16> to vector<2x8x8xbf16>
    %43 = vector.extract_strided_slice %15 {offsets = [0, 0, 8], sizes = [2, 8, 8], strides = [1, 1, 1]} : vector<2x8x32xbf16> to vector<2x8x8xbf16>
    "tpu.trace_start"() <{level = 10 : i32, message = "bqd,bkd->bqk"}> : () -> ()
    %cst_17 = arith.constant dense<0.000000e+00> : vector<2x8x8xf32>
    %44 = tpu.matmul %42, %43, %cst_17 {dimension_numbers = #tpu.dot_dimension_numbers<[2], [2], [1], [1], [0, 0, 0, 1, 1, 1], [0], [0]>} : vector<2x8x8xbf16>, vector<2x8x8xbf16>, vector<2x8x8xf32> -> vector<2x8x8xf32>
    "tpu.trace_stop"() : () -> ()
    %cst_18 = arith.constant 0.353553385 : f32
    %45 = vector.broadcast %cst_18 : f32 to vector<2x8x8xf32>
    %46 = arith.mulf %44, %45 : vector<2x8x8xf32>
    %47 = arith.addf %46, %22 : vector<2x8x8xf32>
    %cst_19 = arith.constant dense<0xFF800000> : vector<2x8xf32>
    %48 = vector.multi_reduction <maximumf>, %47, %cst_19 [2] : vector<2x8x8xf32> to vector<2x8xf32>
    %49 = vector.shape_cast %48 : vector<2x8xf32> to vector<2x8x1xf32>
    %50 = vector.broadcast %49 : vector<2x8x1xf32> to vector<2x8x8xf32>
    %51 = arith.subf %47, %50 : vector<2x8x8xf32>
    %52 = math.exp %51 : vector<2x8x8xf32>
    %cst_20 = arith.constant dense<0.000000e+00> : vector<2x8xf32>
    %53 = vector.multi_reduction <add>, %52, %cst_20 [2] : vector<2x8x8xf32> to vector<2x8xf32>
    %54 = vector.shape_cast %53 : vector<2x8xf32> to vector<2x8x1xf32>
    %55 = tpu.reciprocal %54 {approx = true} : vector<2x8x1xf32> -> vector<2x8x1xf32>
    %56 = vector.broadcast %55 : vector<2x8x1xf32> to vector<2x8x8xf32>
    %57 = arith.mulf %52, %56 : vector<2x8x8xf32>
    %58 = arith.truncf %57 : vector<2x8x8xf32> to vector<2x8x8xbf16>
    %59 = vector.extract_strided_slice %17 {offsets = [0, 0, 8], sizes = [2, 8, 8], strides = [1, 1, 1]} : vector<2x8x32xbf16> to vector<2x8x8xbf16>
    "tpu.trace_start"() <{level = 10 : i32, message = "bqk,bkd->bqd"}> : () -> ()
    %cst_21 = arith.constant dense<0.000000e+00> : vector<2x8x8xf32>
    %60 = tpu.matmul %58, %59, %cst_21 {dimension_numbers = #tpu.dot_dimension_numbers<[2], [1], [1], [2], [0, 0, 0, 1, 1, 2], [0], [0]>} : vector<2x8x8xbf16>, vector<2x8x8xbf16>, vector<2x8x8xf32> -> vector<2x8x8xf32>
    "tpu.trace_stop"() : () -> ()
    %61 = vector.extract_strided_slice %13 {offsets = [0, 0, 16], sizes = [2, 8, 8], strides = [1, 1, 1]} : vector<2x8x32xbf16> to vector<2x8x8xbf16>
    %62 = vector.extract_strided_slice %15 {offsets = [0, 0, 16], sizes = [2, 8, 8], strides = [1, 1, 1]} : vector<2x8x32xbf16> to vector<2x8x8xbf16>
    "tpu.trace_start"() <{level = 10 : i32, message = "bqd,bkd->bqk"}> : () -> ()
    %cst_22 = arith.constant dense<0.000000e+00> : vector<2x8x8xf32>
    %63 = tpu.matmul %61, %62, %cst_22 {dimension_numbers = #tpu.dot_dimension_numbers<[2], [2], [1], [1], [0, 0, 0, 1, 1, 1], [0], [0]>} : vector<2x8x8xbf16>, vector<2x8x8xbf16>, vector<2x8x8xf32> -> vector<2x8x8xf32>
    "tpu.trace_stop"() : () -> ()
    %cst_23 = arith.constant 0.353553385 : f32
    %64 = vector.broadcast %cst_23 : f32 to vector<2x8x8xf32>
    %65 = arith.mulf %63, %64 : vector<2x8x8xf32>
    %66 = arith.addf %65, %22 : vector<2x8x8xf32>
    %cst_24 = arith.constant dense<0xFF800000> : vector<2x8xf32>
    %67 = vector.multi_reduction <maximumf>, %66, %cst_24 [2] : vector<2x8x8xf32> to vector<2x8xf32>
    %68 = vector.shape_cast %67 : vector<2x8xf32> to vector<2x8x1xf32>
    %69 = vector.broadcast %68 : vector<2x8x1xf32> to vector<2x8x8xf32>
    %70 = arith.subf %66, %69 : vector<2x8x8xf32>
    %71 = math.exp %70 : vector<2x8x8xf32>
    %cst_25 = arith.constant dense<0.000000e+00> : vector<2x8xf32>
    %72 = vector.multi_reduction <add>, %71, %cst_25 [2] : vector<2x8x8xf32> to vector<2x8xf32>
    %73 = vector.shape_cast %72 : vector<2x8xf32> to vector<2x8x1xf32>
    %74 = tpu.reciprocal %73 {approx = true} : vector<2x8x1xf32> -> vector<2x8x1xf32>
    %75 = vector.broadcast %74 : vector<2x8x1xf32> to vector<2x8x8xf32>
    %76 = arith.mulf %71, %75 : vector<2x8x8xf32>
    %77 = arith.truncf %76 : vector<2x8x8xf32> to vector<2x8x8xbf16>
    %78 = vector.extract_strided_slice %17 {offsets = [0, 0, 16], sizes = [2, 8, 8], strides = [1, 1, 1]} : vector<2x8x32xbf16> to vector<2x8x8xbf16>
    "tpu.trace_start"() <{level = 10 : i32, message = "bqk,bkd->bqd"}> : () -> ()
    %cst_26 = arith.constant dense<0.000000e+00> : vector<2x8x8xf32>
    %79 = tpu.matmul %77, %78, %cst_26 {dimension_numbers = #tpu.dot_dimension_numbers<[2], [1], [1], [2], [0, 0, 0, 1, 1, 2], [0], [0]>} : vector<2x8x8xbf16>, vector<2x8x8xbf16>, vector<2x8x8xf32> -> vector<2x8x8xf32>
    "tpu.trace_stop"() : () -> ()
    %80 = vector.extract_strided_slice %13 {offsets = [0, 0, 24], sizes = [2, 8, 8], strides = [1, 1, 1]} : vector<2x8x32xbf16> to vector<2x8x8xbf16>
    %81 = vector.extract_strided_slice %15 {offsets = [0, 0, 24], sizes = [2, 8, 8], strides = [1, 1, 1]} : vector<2x8x32xbf16> to vector<2x8x8xbf16>
    "tpu.trace_start"() <{level = 10 : i32, message = "bqd,bkd->bqk"}> : () -> ()
    %cst_27 = arith.constant dense<0.000000e+00> : vector<2x8x8xf32>
    %82 = tpu.matmul %80, %81, %cst_27 {dimension_numbers = #tpu.dot_dimension_numbers<[2], [2], [1], [1], [0, 0, 0, 1, 1, 1], [0], [0]>} : vector<2x8x8xbf16>, vector<2x8x8xbf16>, vector<2x8x8xf32> -> vector<2x8x8xf32>
    "tpu.trace_stop"() : () -> ()
    %cst_28 = arith.constant 0.353553385 : f32
    %83 = vector.broadcast %cst_28 : f32 to vector<2x8x8xf32>
    %84 = arith.mulf %82, %83 : vector<2x8x8xf32>
    %85 = arith.addf %84, %22 : vector<2x8x8xf32>
    %cst_29 = arith.constant dense<0xFF800000> : vector<2x8xf32>
    %86 = vector.multi_reduction <maximumf>, %85, %cst_29 [2] : vector<2x8x8xf32> to vector<2x8xf32>
    %87 = vector.shape_cast %86 : vector<2x8xf32> to vector<2x8x1xf32>
    %88 = vector.broadcast %87 : vector<2x8x1xf32> to vector<2x8x8xf32>
    %89 = arith.subf %85, %88 : vector<2x8x8xf32>
    %90 = math.exp %89 : vector<2x8x8xf32>
    %cst_30 = arith.constant dense<0.000000e+00> : vector<2x8xf32>
    %91 = vector.multi_reduction <add>, %90, %cst_30 [2] : vector<2x8x8xf32> to vector<2x8xf32>
    %92 = vector.shape_cast %91 : vector<2x8xf32> to vector<2x8x1xf32>
    %93 = tpu.reciprocal %92 {approx = true} : vector<2x8x1xf32> -> vector<2x8x1xf32>
    %94 = vector.broadcast %93 : vector<2x8x1xf32> to vector<2x8x8xf32>
    %95 = arith.mulf %90, %94 : vector<2x8x8xf32>
    %96 = arith.truncf %95 : vector<2x8x8xf32> to vector<2x8x8xbf16>
    %97 = vector.extract_strided_slice %17 {offsets = [0, 0, 24], sizes = [2, 8, 8], strides = [1, 1, 1]} : vector<2x8x32xbf16> to vector<2x8x8xbf16>
    "tpu.trace_start"() <{level = 10 : i32, message = "bqk,bkd->bqd"}> : () -> ()
    %cst_31 = arith.constant dense<0.000000e+00> : vector<2x8x8xf32>
    %98 = tpu.matmul %96, %97, %cst_31 {dimension_numbers = #tpu.dot_dimension_numbers<[2], [1], [1], [2], [0, 0, 0, 1, 1, 2], [0], [0]>} : vector<2x8x8xbf16>, vector<2x8x8xbf16>, vector<2x8x8xf32> -> vector<2x8x8xf32>
    "tpu.trace_stop"() : () -> ()
    %99 = tpu.concatenate %41, %60, %79, %98 in 2 : vector<2x8x8xf32>, vector<2x8x8xf32>, vector<2x8x8xf32>, vector<2x8x8xf32> -> vector<2x8x32xf32>
    %100 = vector.shape_cast %99 : vector<2x8x32xf32> to vector<16x32xf32>
    %101 = arith.truncf %100 : vector<16x32xf32> to vector<16x32xbf16>
    %c0_32 = arith.constant 0 : index
    %c0_33 = arith.constant 0 : index
    %102 = vector.load %arg7[%c0_32, %c0_33] : memref<32x32xbf16, #tpu.memory_space<vmem>>, vector<32x32xbf16>
    %cst_34 = arith.constant dense<0.000000e+00> : vector<16x32xf32>
    %103 = tpu.matmul %101, %102, %cst_34 {dimension_numbers = #tpu.dot_dimension_numbers<[1], [0], [0], [1], [0, 0, 1, 1], [], []>} : vector<16x32xbf16>, vector<32x32xbf16>, vector<16x32xf32> -> vector<16x32xf32>
    %c0_35 = arith.constant 0 : index
    %c0_36 = arith.constant 0 : index
    %104 = vector.load %arg8[%c0_35, %c0_36] : memref<1x32xf32, #tpu.memory_space<vmem>>, vector<1x32xf32>
    %105 = vector.broadcast %104 : vector<1x32xf32> to vector<16x32xf32>
    %106 = arith.addf %103, %105 : vector<16x32xf32>
    %c0_37 = arith.constant 0 : index
    %c0_38 = arith.constant 0 : index
    %107 = vector.load %arg19[%c0_37, %c0_38] : memref<6x32xf32, #tpu.memory_space<vmem>>, vector<1x32xf32>
    %c1 = arith.constant 1 : index
    %c0_39 = arith.constant 0 : index
    %108 = vector.load %arg19[%c1, %c0_39] : memref<6x32xf32, #tpu.memory_space<vmem>>, vector<1x32xf32>
    %109 = arith.addf %106, %1 : vector<16x32xf32>
    %cst_40 = arith.constant dense<0.000000e+00> : vector<16xf32>
    %110 = vector.multi_reduction <add>, %109, %cst_40 [1] : vector<16x32xf32> to vector<16xf32>
    %111 = vector.shape_cast %110 : vector<16xf32> to vector<16x1xf32>
    %cst_41 = arith.constant 3.200000e+01 : f32
    %112 = vector.broadcast %cst_41 : f32 to vector<16x1xf32>
    %113 = arith.divf %111, %112 : vector<16x1xf32>
    %114 = vector.broadcast %113 : vector<16x1xf32> to vector<16x32xf32>
    %115 = arith.subf %109, %114 : vector<16x32xf32>
    %116 = arith.mulf %115, %115 : vector<16x32xf32>
    %cst_42 = arith.constant dense<0.000000e+00> : vector<16xf32>
    %117 = vector.multi_reduction <add>, %116, %cst_42 [1] : vector<16x32xf32> to vector<16xf32>
    %118 = vector.shape_cast %117 : vector<16xf32> to vector<16x1xf32>
    %cst_43 = arith.constant 3.200000e+01 : f32
    %119 = vector.broadcast %cst_43 : f32 to vector<16x1xf32>
    %120 = arith.divf %118, %119 : vector<16x1xf32>
    %121 = vector.broadcast %113 : vector<16x1xf32> to vector<16x32xf32>
    %122 = arith.subf %109, %121 : vector<16x32xf32>
    %cst_44 = arith.constant 9.99999974E-6 : f32
    %123 = vector.broadcast %cst_44 : f32 to vector<16x1xf32>
    %124 = arith.addf %120, %123 : vector<16x1xf32>
    %125 = math.rsqrt %124 : vector<16x1xf32>
    %126 = vector.broadcast %125 : vector<16x1xf32> to vector<16x32xf32>
    %127 = arith.mulf %122, %126 : vector<16x32xf32>
    %128 = vector.broadcast %107 : vector<1x32xf32> to vector<16x32xf32>
    %129 = arith.mulf %127, %128 : vector<16x32xf32>
    %130 = vector.broadcast %108 : vector<1x32xf32> to vector<16x32xf32>
    %131 = arith.addf %129, %130 : vector<16x32xf32>
    %c0_45 = arith.constant 0 : index
    %c0_46 = arith.constant 0 : index
    %c0_47 = arith.constant 0 : index
    %132 = vector.load %arg2[%c0_45, %c0_46, %c0_47] : memref<2x8x32xf32, #tpu.memory_space<vmem>>, vector<2x8x32xf32>
    %133 = vector.shape_cast %132 : vector<2x8x32xf32> to vector<16x32xf32>
    %134 = arith.truncf %131 : vector<16x32xf32> to vector<16x32xbf16>
    %c0_48 = arith.constant 0 : index
    %c0_49 = arith.constant 0 : index
    %135 = vector.load %arg9[%c0_48, %c0_49] : memref<32x32xbf16, #tpu.memory_space<vmem>>, vector<32x32xbf16>
    %cst_50 = arith.constant dense<0.000000e+00> : vector<16x32xf32>
    %136 = tpu.matmul %134, %135, %cst_50 {dimension_numbers = #tpu.dot_dimension_numbers<[1], [0], [0], [1], [0, 0, 1, 1], [], []>} : vector<16x32xbf16>, vector<32x32xbf16>, vector<16x32xf32> -> vector<16x32xf32>
    %c0_51 = arith.constant 0 : index
    %c0_52 = arith.constant 0 : index
    %137 = vector.load %arg10[%c0_51, %c0_52] : memref<1x32xf32, #tpu.memory_space<vmem>>, vector<1x32xf32>
    %138 = vector.broadcast %137 : vector<1x32xf32> to vector<16x32xf32>
    %139 = arith.addf %136, %138 : vector<16x32xf32>
    %140 = arith.truncf %133 : vector<16x32xf32> to vector<16x32xbf16>
    %c0_53 = arith.constant 0 : index
    %c0_54 = arith.constant 0 : index
    %141 = vector.load %arg11[%c0_53, %c0_54] : memref<32x64xbf16, #tpu.memory_space<vmem>>, vector<32x64xbf16>
    %cst_55 = arith.constant dense<0.000000e+00> : vector<16x64xf32>
    %142 = tpu.matmul %140, %141, %cst_55 {dimension_numbers = #tpu.dot_dimension_numbers<[1], [0], [0], [1], [0, 0, 1, 1], [], []>} : vector<16x32xbf16>, vector<32x64xbf16>, vector<16x64xf32> -> vector<16x64xf32>
    %c0_56 = arith.constant 0 : index
    %c0_57 = arith.constant 0 : index
    %143 = vector.load %arg12[%c0_56, %c0_57] : memref<1x64xf32, #tpu.memory_space<vmem>>, vector<1x64xf32>
    %144 = vector.broadcast %143 : vector<1x64xf32> to vector<16x64xf32>
    %145 = arith.addf %142, %144 : vector<16x64xf32>
    %146 = vector.extract_strided_slice %145 {offsets = [0, 0], sizes = [16, 32], strides = [1, 1]} : vector<16x64xf32> to vector<16x32xf32>
    %147 = vector.extract_strided_slice %145 {offsets = [0, 32], sizes = [16, 32], strides = [1, 1]} : vector<16x64xf32> to vector<16x32xf32>
    %c0_58 = arith.constant 0 : index
    %c0_59 = arith.constant 0 : index
    %c0_60 = arith.constant 0 : index
    %148 = vector.load %arg4[%c0_58, %c0_59, %c0_60] : memref<2x8x8xf32, #tpu.memory_space<vmem>>, vector<2x8x8xf32>
    %149 = vector.shape_cast %139 : vector<16x32xf32> to vector<2x8x32xf32>
    %150 = arith.truncf %149 : vector<2x8x32xf32> to vector<2x8x32xbf16>
    %151 = vector.shape_cast %146 : vector<16x32xf32> to vector<2x8x32xf32>
    %152 = arith.truncf %151 : vector<2x8x32xf32> to vector<2x8x32xbf16>
    %153 = vector.shape_cast %147 : vector<16x32xf32> to vector<2x8x32xf32>
    %154 = arith.truncf %153 : vector<2x8x32xf32> to vector<2x8x32xbf16>
    %cst_61 = arith.constant 0.000000e+00 : f32
    %155 = vector.broadcast %cst_61 : f32 to vector<2x8x8xf32>
    %156 = arith.cmpf oeq, %148, %155 : vector<2x8x8xf32>
    %cst_62 = arith.constant -1.000000e+04 : f32
    %cst_63 = arith.constant 0.000000e+00 : f32
    %157 = vector.broadcast %cst_62 : f32 to vector<2x8x8xf32>
    %158 = vector.broadcast %cst_63 : f32 to vector<2x8x8xf32>
    %159 = arith.select %156, %157, %158 : vector<2x8x8xi1>, vector<2x8x8xf32>
    %160 = vector.extract_strided_slice %150 {offsets = [0, 0, 0], sizes = [2, 8, 8], strides = [1, 1, 1]} : vector<2x8x32xbf16> to vector<2x8x8xbf16>
    %161 = vector.extract_strided_slice %152 {offsets = [0, 0, 0], sizes = [2, 8, 8], strides = [1, 1, 1]} : vector<2x8x32xbf16> to vector<2x8x8xbf16>
    "tpu.trace_start"() <{level = 10 : i32, message = "bqd,bkd->bqk"}> : () -> ()
    %cst_64 = arith.constant dense<0.000000e+00> : vector<2x8x8xf32>
    %162 = tpu.matmul %160, %161, %cst_64 {dimension_numbers = #tpu.dot_dimension_numbers<[2], [2], [1], [1], [0, 0, 0, 1, 1, 1], [0], [0]>} : vector<2x8x8xbf16>, vector<2x8x8xbf16>, vector<2x8x8xf32> -> vector<2x8x8xf32>
    "tpu.trace_stop"() : () -> ()
    %cst_65 = arith.constant 0.353553385 : f32
    %163 = vector.broadcast %cst_65 : f32 to vector<2x8x8xf32>
    %164 = arith.mulf %162, %163 : vector<2x8x8xf32>
    %165 = arith.addf %164, %159 : vector<2x8x8xf32>
    %cst_66 = arith.constant dense<0xFF800000> : vector<2x8xf32>
    %166 = vector.multi_reduction <maximumf>, %165, %cst_66 [2] : vector<2x8x8xf32> to vector<2x8xf32>
    %167 = vector.shape_cast %166 : vector<2x8xf32> to vector<2x8x1xf32>
    %168 = vector.broadcast %167 : vector<2x8x1xf32> to vector<2x8x8xf32>
    %169 = arith.subf %165, %168 : vector<2x8x8xf32>
    %170 = math.exp %169 : vector<2x8x8xf32>
    %cst_67 = arith.constant dense<0.000000e+00> : vector<2x8xf32>
    %171 = vector.multi_reduction <add>, %170, %cst_67 [2] : vector<2x8x8xf32> to vector<2x8xf32>
    %172 = vector.shape_cast %171 : vector<2x8xf32> to vector<2x8x1xf32>
    %173 = tpu.reciprocal %172 {approx = true} : vector<2x8x1xf32> -> vector<2x8x1xf32>
    %174 = vector.broadcast %173 : vector<2x8x1xf32> to vector<2x8x8xf32>
    %175 = arith.mulf %170, %174 : vector<2x8x8xf32>
    %176 = arith.truncf %175 : vector<2x8x8xf32> to vector<2x8x8xbf16>
    %177 = vector.extract_strided_slice %154 {offsets = [0, 0, 0], sizes = [2, 8, 8], strides = [1, 1, 1]} : vector<2x8x32xbf16> to vector<2x8x8xbf16>
    "tpu.trace_start"() <{level = 10 : i32, message = "bqk,bkd->bqd"}> : () -> ()
    %cst_68 = arith.constant dense<0.000000e+00> : vector<2x8x8xf32>
    %178 = tpu.matmul %176, %177, %cst_68 {dimension_numbers = #tpu.dot_dimension_numbers<[2], [1], [1], [2], [0, 0, 0, 1, 1, 2], [0], [0]>} : vector<2x8x8xbf16>, vector<2x8x8xbf16>, vector<2x8x8xf32> -> vector<2x8x8xf32>
    "tpu.trace_stop"() : () -> ()
    %179 = vector.extract_strided_slice %150 {offsets = [0, 0, 8], sizes = [2, 8, 8], strides = [1, 1, 1]} : vector<2x8x32xbf16> to vector<2x8x8xbf16>
    %180 = vector.extract_strided_slice %152 {offsets = [0, 0, 8], sizes = [2, 8, 8], strides = [1, 1, 1]} : vector<2x8x32xbf16> to vector<2x8x8xbf16>
    "tpu.trace_start"() <{level = 10 : i32, message = "bqd,bkd->bqk"}> : () -> ()
    %cst_69 = arith.constant dense<0.000000e+00> : vector<2x8x8xf32>
    %181 = tpu.matmul %179, %180, %cst_69 {dimension_numbers = #tpu.dot_dimension_numbers<[2], [2], [1], [1], [0, 0, 0, 1, 1, 1], [0], [0]>} : vector<2x8x8xbf16>, vector<2x8x8xbf16>, vector<2x8x8xf32> -> vector<2x8x8xf32>
    "tpu.trace_stop"() : () -> ()
    %cst_70 = arith.constant 0.353553385 : f32
    %182 = vector.broadcast %cst_70 : f32 to vector<2x8x8xf32>
    %183 = arith.mulf %181, %182 : vector<2x8x8xf32>
    %184 = arith.addf %183, %159 : vector<2x8x8xf32>
    %cst_71 = arith.constant dense<0xFF800000> : vector<2x8xf32>
    %185 = vector.multi_reduction <maximumf>, %184, %cst_71 [2] : vector<2x8x8xf32> to vector<2x8xf32>
    %186 = vector.shape_cast %185 : vector<2x8xf32> to vector<2x8x1xf32>
    %187 = vector.broadcast %186 : vector<2x8x1xf32> to vector<2x8x8xf32>
    %188 = arith.subf %184, %187 : vector<2x8x8xf32>
    %189 = math.exp %188 : vector<2x8x8xf32>
    %cst_72 = arith.constant dense<0.000000e+00> : vector<2x8xf32>
    %190 = vector.multi_reduction <add>, %189, %cst_72 [2] : vector<2x8x8xf32> to vector<2x8xf32>
    %191 = vector.shape_cast %190 : vector<2x8xf32> to vector<2x8x1xf32>
    %192 = tpu.reciprocal %191 {approx = true} : vector<2x8x1xf32> -> vector<2x8x1xf32>
    %193 = vector.broadcast %192 : vector<2x8x1xf32> to vector<2x8x8xf32>
    %194 = arith.mulf %189, %193 : vector<2x8x8xf32>
    %195 = arith.truncf %194 : vector<2x8x8xf32> to vector<2x8x8xbf16>
    %196 = vector.extract_strided_slice %154 {offsets = [0, 0, 8], sizes = [2, 8, 8], strides = [1, 1, 1]} : vector<2x8x32xbf16> to vector<2x8x8xbf16>
    "tpu.trace_start"() <{level = 10 : i32, message = "bqk,bkd->bqd"}> : () -> ()
    %cst_73 = arith.constant dense<0.000000e+00> : vector<2x8x8xf32>
    %197 = tpu.matmul %195, %196, %cst_73 {dimension_numbers = #tpu.dot_dimension_numbers<[2], [1], [1], [2], [0, 0, 0, 1, 1, 2], [0], [0]>} : vector<2x8x8xbf16>, vector<2x8x8xbf16>, vector<2x8x8xf32> -> vector<2x8x8xf32>
    "tpu.trace_stop"() : () -> ()
    %198 = vector.extract_strided_slice %150 {offsets = [0, 0, 16], sizes = [2, 8, 8], strides = [1, 1, 1]} : vector<2x8x32xbf16> to vector<2x8x8xbf16>
    %199 = vector.extract_strided_slice %152 {offsets = [0, 0, 16], sizes = [2, 8, 8], strides = [1, 1, 1]} : vector<2x8x32xbf16> to vector<2x8x8xbf16>
    "tpu.trace_start"() <{level = 10 : i32, message = "bqd,bkd->bqk"}> : () -> ()
    %cst_74 = arith.constant dense<0.000000e+00> : vector<2x8x8xf32>
    %200 = tpu.matmul %198, %199, %cst_74 {dimension_numbers = #tpu.dot_dimension_numbers<[2], [2], [1], [1], [0, 0, 0, 1, 1, 1], [0], [0]>} : vector<2x8x8xbf16>, vector<2x8x8xbf16>, vector<2x8x8xf32> -> vector<2x8x8xf32>
    "tpu.trace_stop"() : () -> ()
    %cst_75 = arith.constant 0.353553385 : f32
    %201 = vector.broadcast %cst_75 : f32 to vector<2x8x8xf32>
    %202 = arith.mulf %200, %201 : vector<2x8x8xf32>
    %203 = arith.addf %202, %159 : vector<2x8x8xf32>
    %cst_76 = arith.constant dense<0xFF800000> : vector<2x8xf32>
    %204 = vector.multi_reduction <maximumf>, %203, %cst_76 [2] : vector<2x8x8xf32> to vector<2x8xf32>
    %205 = vector.shape_cast %204 : vector<2x8xf32> to vector<2x8x1xf32>
    %206 = vector.broadcast %205 : vector<2x8x1xf32> to vector<2x8x8xf32>
    %207 = arith.subf %203, %206 : vector<2x8x8xf32>
    %208 = math.exp %207 : vector<2x8x8xf32>
    %cst_77 = arith.constant dense<0.000000e+00> : vector<2x8xf32>
    %209 = vector.multi_reduction <add>, %208, %cst_77 [2] : vector<2x8x8xf32> to vector<2x8xf32>
    %210 = vector.shape_cast %209 : vector<2x8xf32> to vector<2x8x1xf32>
    %211 = tpu.reciprocal %210 {approx = true} : vector<2x8x1xf32> -> vector<2x8x1xf32>
    %212 = vector.broadcast %211 : vector<2x8x1xf32> to vector<2x8x8xf32>
    %213 = arith.mulf %208, %212 : vector<2x8x8xf32>
    %214 = arith.truncf %213 : vector<2x8x8xf32> to vector<2x8x8xbf16>
    %215 = vector.extract_strided_slice %154 {offsets = [0, 0, 16], sizes = [2, 8, 8], strides = [1, 1, 1]} : vector<2x8x32xbf16> to vector<2x8x8xbf16>
    "tpu.trace_start"() <{level = 10 : i32, message = "bqk,bkd->bqd"}> : () -> ()
    %cst_78 = arith.constant dense<0.000000e+00> : vector<2x8x8xf32>
    %216 = tpu.matmul %214, %215, %cst_78 {dimension_numbers = #tpu.dot_dimension_numbers<[2], [1], [1], [2], [0, 0, 0, 1, 1, 2], [0], [0]>} : vector<2x8x8xbf16>, vector<2x8x8xbf16>, vector<2x8x8xf32> -> vector<2x8x8xf32>
    "tpu.trace_stop"() : () -> ()
    %217 = vector.extract_strided_slice %150 {offsets = [0, 0, 24], sizes = [2, 8, 8], strides = [1, 1, 1]} : vector<2x8x32xbf16> to vector<2x8x8xbf16>
    %218 = vector.extract_strided_slice %152 {offsets = [0, 0, 24], sizes = [2, 8, 8], strides = [1, 1, 1]} : vector<2x8x32xbf16> to vector<2x8x8xbf16>
    "tpu.trace_start"() <{level = 10 : i32, message = "bqd,bkd->bqk"}> : () -> ()
    %cst_79 = arith.constant dense<0.000000e+00> : vector<2x8x8xf32>
    %219 = tpu.matmul %217, %218, %cst_79 {dimension_numbers = #tpu.dot_dimension_numbers<[2], [2], [1], [1], [0, 0, 0, 1, 1, 1], [0], [0]>} : vector<2x8x8xbf16>, vector<2x8x8xbf16>, vector<2x8x8xf32> -> vector<2x8x8xf32>
    "tpu.trace_stop"() : () -> ()
    %cst_80 = arith.constant 0.353553385 : f32
    %220 = vector.broadcast %cst_80 : f32 to vector<2x8x8xf32>
    %221 = arith.mulf %219, %220 : vector<2x8x8xf32>
    %222 = arith.addf %221, %159 : vector<2x8x8xf32>
    %cst_81 = arith.constant dense<0xFF800000> : vector<2x8xf32>
    %223 = vector.multi_reduction <maximumf>, %222, %cst_81 [2] : vector<2x8x8xf32> to vector<2x8xf32>
    %224 = vector.shape_cast %223 : vector<2x8xf32> to vector<2x8x1xf32>
    %225 = vector.broadcast %224 : vector<2x8x1xf32> to vector<2x8x8xf32>
    %226 = arith.subf %222, %225 : vector<2x8x8xf32>
    %227 = math.exp %226 : vector<2x8x8xf32>
    %cst_82 = arith.constant dense<0.000000e+00> : vector<2x8xf32>
    %228 = vector.multi_reduction <add>, %227, %cst_82 [2] : vector<2x8x8xf32> to vector<2x8xf32>
    %229 = vector.shape_cast %228 : vector<2x8xf32> to vector<2x8x1xf32>
    %230 = tpu.reciprocal %229 {approx = true} : vector<2x8x1xf32> -> vector<2x8x1xf32>
    %231 = vector.broadcast %230 : vector<2x8x1xf32> to vector<2x8x8xf32>
    %232 = arith.mulf %227, %231 : vector<2x8x8xf32>
    %233 = arith.truncf %232 : vector<2x8x8xf32> to vector<2x8x8xbf16>
    %234 = vector.extract_strided_slice %154 {offsets = [0, 0, 24], sizes = [2, 8, 8], strides = [1, 1, 1]} : vector<2x8x32xbf16> to vector<2x8x8xbf16>
    "tpu.trace_start"() <{level = 10 : i32, message = "bqk,bkd->bqd"}> : () -> ()
    %cst_83 = arith.constant dense<0.000000e+00> : vector<2x8x8xf32>
    %235 = tpu.matmul %233, %234, %cst_83 {dimension_numbers = #tpu.dot_dimension_numbers<[2], [1], [1], [2], [0, 0, 0, 1, 1, 2], [0], [0]>} : vector<2x8x8xbf16>, vector<2x8x8xbf16>, vector<2x8x8xf32> -> vector<2x8x8xf32>
    "tpu.trace_stop"() : () -> ()
    %236 = tpu.concatenate %178, %197, %216, %235 in 2 : vector<2x8x8xf32>, vector<2x8x8xf32>, vector<2x8x8xf32>, vector<2x8x8xf32> -> vector<2x8x32xf32>
    %237 = vector.shape_cast %236 : vector<2x8x32xf32> to vector<16x32xf32>
    %238 = arith.truncf %237 : vector<16x32xf32> to vector<16x32xbf16>
    %c0_84 = arith.constant 0 : index
    %c0_85 = arith.constant 0 : index
    %239 = vector.load %arg13[%c0_84, %c0_85] : memref<32x32xbf16, #tpu.memory_space<vmem>>, vector<32x32xbf16>
    %cst_86 = arith.constant dense<0.000000e+00> : vector<16x32xf32>
    %240 = tpu.matmul %238, %239, %cst_86 {dimension_numbers = #tpu.dot_dimension_numbers<[1], [0], [0], [1], [0, 0, 1, 1], [], []>} : vector<16x32xbf16>, vector<32x32xbf16>, vector<16x32xf32> -> vector<16x32xf32>
    %c0_87 = arith.constant 0 : index
    %c0_88 = arith.constant 0 : index
    %241 = vector.load %arg14[%c0_87, %c0_88] : memref<1x32xf32, #tpu.memory_space<vmem>>, vector<1x32xf32>
    %242 = vector.broadcast %241 : vector<1x32xf32> to vector<16x32xf32>
    %243 = arith.addf %240, %242 : vector<16x32xf32>
    %c2 = arith.constant 2 : index
    %c0_89 = arith.constant 0 : index
    %244 = vector.load %arg19[%c2, %c0_89] : memref<6x32xf32, #tpu.memory_space<vmem>>, vector<1x32xf32>
    %c3 = arith.constant 3 : index
    %c0_90 = arith.constant 0 : index
    %245 = vector.load %arg19[%c3, %c0_90] : memref<6x32xf32, #tpu.memory_space<vmem>>, vector<1x32xf32>
    %246 = arith.addf %243, %131 : vector<16x32xf32>
    %cst_91 = arith.constant dense<0.000000e+00> : vector<16xf32>
    %247 = vector.multi_reduction <add>, %246, %cst_91 [1] : vector<16x32xf32> to vector<16xf32>
    %248 = vector.shape_cast %247 : vector<16xf32> to vector<16x1xf32>
    %cst_92 = arith.constant 3.200000e+01 : f32
    %249 = vector.broadcast %cst_92 : f32 to vector<16x1xf32>
    %250 = arith.divf %248, %249 : vector<16x1xf32>
    %251 = vector.broadcast %250 : vector<16x1xf32> to vector<16x32xf32>
    %252 = arith.subf %246, %251 : vector<16x32xf32>
    %253 = arith.mulf %252, %252 : vector<16x32xf32>
    %cst_93 = arith.constant dense<0.000000e+00> : vector<16xf32>
    %254 = vector.multi_reduction <add>, %253, %cst_93 [1] : vector<16x32xf32> to vector<16xf32>
    %255 = vector.shape_cast %254 : vector<16xf32> to vector<16x1xf32>
    %cst_94 = arith.constant 3.200000e+01 : f32
    %256 = vector.broadcast %cst_94 : f32 to vector<16x1xf32>
    %257 = arith.divf %255, %256 : vector<16x1xf32>
    %258 = vector.broadcast %250 : vector<16x1xf32> to vector<16x32xf32>
    %259 = arith.subf %246, %258 : vector<16x32xf32>
    %cst_95 = arith.constant 9.99999974E-6 : f32
    %260 = vector.broadcast %cst_95 : f32 to vector<16x1xf32>
    %261 = arith.addf %257, %260 : vector<16x1xf32>
    %262 = math.rsqrt %261 : vector<16x1xf32>
    %263 = vector.broadcast %262 : vector<16x1xf32> to vector<16x32xf32>
    %264 = arith.mulf %259, %263 : vector<16x32xf32>
    %265 = vector.broadcast %244 : vector<1x32xf32> to vector<16x32xf32>
    %266 = arith.mulf %264, %265 : vector<16x32xf32>
    %267 = vector.broadcast %245 : vector<1x32xf32> to vector<16x32xf32>
    %268 = arith.addf %266, %267 : vector<16x32xf32>
    %269 = arith.truncf %268 : vector<16x32xf32> to vector<16x32xbf16>
    %c0_96 = arith.constant 0 : index
    %c0_97 = arith.constant 0 : index
    %270 = vector.load %arg15[%c0_96, %c0_97] : memref<32x64xbf16, #tpu.memory_space<vmem>>, vector<32x64xbf16>
    %cst_98 = arith.constant dense<0.000000e+00> : vector<16x64xf32>
    %271 = tpu.matmul %269, %270, %cst_98 {dimension_numbers = #tpu.dot_dimension_numbers<[1], [0], [0], [1], [0, 0, 1, 1], [], []>} : vector<16x32xbf16>, vector<32x64xbf16>, vector<16x64xf32> -> vector<16x64xf32>
    %c0_99 = arith.constant 0 : index
    %c0_100 = arith.constant 0 : index
    %272 = vector.load %arg16[%c0_99, %c0_100] : memref<1x64xf32, #tpu.memory_space<vmem>>, vector<1x64xf32>
    %273 = vector.broadcast %272 : vector<1x64xf32> to vector<16x64xf32>
    %274 = arith.addf %271, %273 : vector<16x64xf32>
    %cst_101 = arith.constant 0.000000e+00 : f32
    %275 = vector.broadcast %cst_101 : f32 to vector<16x64xf32>
    %276 = arith.maximumf %274, %275 : vector<16x64xf32>
    %277 = arith.truncf %276 : vector<16x64xf32> to vector<16x64xbf16>
    %c0_102 = arith.constant 0 : index
    %c0_103 = arith.constant 0 : index
    %278 = vector.load %arg17[%c0_102, %c0_103] : memref<64x32xbf16, #tpu.memory_space<vmem>>, vector<64x32xbf16>
    %cst_104 = arith.constant dense<0.000000e+00> : vector<16x32xf32>
    %279 = tpu.matmul %277, %278, %cst_104 {dimension_numbers = #tpu.dot_dimension_numbers<[1], [0], [0], [1], [0, 0, 1, 1], [], []>} : vector<16x64xbf16>, vector<64x32xbf16>, vector<16x32xf32> -> vector<16x32xf32>
    %c0_105 = arith.constant 0 : index
    %c0_106 = arith.constant 0 : index
    %280 = vector.load %arg18[%c0_105, %c0_106] : memref<1x32xf32, #tpu.memory_space<vmem>>, vector<1x32xf32>
    %281 = vector.broadcast %280 : vector<1x32xf32> to vector<16x32xf32>
    %282 = arith.addf %279, %281 : vector<16x32xf32>
    %c4 = arith.constant 4 : index
    %c0_107 = arith.constant 0 : index
    %283 = vector.load %arg19[%c4, %c0_107] : memref<6x32xf32, #tpu.memory_space<vmem>>, vector<1x32xf32>
    %c5 = arith.constant 5 : index
    %c0_108 = arith.constant 0 : index
    %284 = vector.load %arg19[%c5, %c0_108] : memref<6x32xf32, #tpu.memory_space<vmem>>, vector<1x32xf32>
    %285 = arith.addf %282, %268 : vector<16x32xf32>
    %cst_109 = arith.constant dense<0.000000e+00> : vector<16xf32>
    %286 = vector.multi_reduction <add>, %285, %cst_109 [1] : vector<16x32xf32> to vector<16xf32>
    %287 = vector.shape_cast %286 : vector<16xf32> to vector<16x1xf32>
    %cst_110 = arith.constant 3.200000e+01 : f32
    %288 = vector.broadcast %cst_110 : f32 to vector<16x1xf32>
    %289 = arith.divf %287, %288 : vector<16x1xf32>
    %290 = vector.broadcast %289 : vector<16x1xf32> to vector<16x32xf32>
    %291 = arith.subf %285, %290 : vector<16x32xf32>
    %292 = arith.mulf %291, %291 : vector<16x32xf32>
    %cst_111 = arith.constant dense<0.000000e+00> : vector<16xf32>
    %293 = vector.multi_reduction <add>, %292, %cst_111 [1] : vector<16x32xf32> to vector<16xf32>
    %294 = vector.shape_cast %293 : vector<16xf32> to vector<16x1xf32>
    %cst_112 = arith.constant 3.200000e+01 : f32
    %295 = vector.broadcast %cst_112 : f32 to vector<16x1xf32>
    %296 = arith.divf %294, %295 : vector<16x1xf32>
    %297 = vector.broadcast %289 : vector<16x1xf32> to vector<16x32xf32>
    %298 = arith.subf %285, %297 : vector<16x32xf32>
    %cst_113 = arith.constant 9.99999974E-6 : f32
    %299 = vector.broadcast %cst_113 : f32 to vector<16x1xf32>
    %300 = arith.addf %296, %299 : vector<16x1xf32>
    %301 = math.rsqrt %300 : vector<16x1xf32>
    %302 = vector.broadcast %301 : vector<16x1xf32> to vector<16x32xf32>
    %303 = arith.mulf %298, %302 : vector<16x32xf32>
    %304 = vector.broadcast %283 : vector<1x32xf32> to vector<16x32xf32>
    %305 = arith.mulf %303, %304 : vector<16x32xf32>
    %306 = vector.broadcast %284 : vector<1x32xf32> to vector<16x32xf32>
    %307 = arith.addf %305, %306 : vector<16x32xf32>
    %308 = vector.shape_cast %307 : vector<16x32xf32> to vector<2x8x32xf32>
    %c0_114 = arith.constant 0 : index
    %c0_115 = arith.constant 0 : index
    %c0_116 = arith.constant 0 : index
    %309 = vector.load %arg20[%c0_114, %c0_115, %c0_116] : memref<2x8x32xf32, #tpu.memory_space<vmem>>, vector<2x8x32xf32>
    tpu.vector_store %arg20[%c0_114, %c0_115, %c0_116], %308 {strides = array<i32>} : memref<2x8x32xf32, #tpu.memory_space<vmem>>, vector<2x8x32xf32>,
    return
  }
  func.func @transform_0(%arg0: i32) -> (i32, i32, i32) {
    %c0_i32 = arith.constant 0 : i32
    %c0_i32_0 = arith.constant 0 : i32
    %c0_i32_1 = arith.constant 0 : i32
    return %arg0, %c0_i32, %c0_i32_0 : i32, i32, i32
  }
  func.func @transform_1(%arg0: i32) -> (i32, i32, i32) {
    %c0_i32 = arith.constant 0 : i32
    %c0_i32_0 = arith.constant 0 : i32
    %c0_i32_1 = arith.constant 0 : i32
    return %arg0, %c0_i32, %c0_i32_0 : i32, i32, i32
  }
  func.func @transform_2(%arg0: i32) -> (i32, i32, i32) {
    %c0_i32 = arith.constant 0 : i32
    %c0_i32_0 = arith.constant 0 : i32
    %c0_i32_1 = arith.constant 0 : i32
    return %arg0, %c0_i32, %c0_i32_0 : i32, i32, i32
  }
  func.func @transform_3(%arg0: i32) -> (i32, i32, i32) {
    %c0_i32 = arith.constant 0 : i32
    %c0_i32_0 = arith.constant 0 : i32
    %c0_i32_1 = arith.constant 0 : i32
    return %arg0, %c0_i32, %c0_i32_0 : i32, i32, i32
  }
  func.func @transform_4(%arg0: i32) -> (i32, i32) {
    %c0_i32 = arith.constant 0 : i32
    %c0_i32_0 = arith.constant 0 : i32
    %c0_i32_1 = arith.constant 0 : i32
    return %c0_i32, %c0_i32_0 : i32, i32
  }
  func.func @transform_5(%arg0: i32) -> (i32, i32) {
    %c0_i32 = arith.constant 0 : i32
    %c0_i32_0 = arith.constant 0 : i32
    %c0_i32_1 = arith.constant 0 : i32
    return %c0_i32, %c0_i32_0 : i32, i32
  }
  func.func @transform_6(%arg0: i32) -> (i32, i32) {
    %c0_i32 = arith.constant 0 : i32
    %c0_i32_0 = arith.constant 0 : i32
    %c0_i32_1 = arith.constant 0 : i32
    return %c0_i32, %c0_i32_0 : i32, i32
  }
  func.func @transform_7(%arg0: i32) -> (i32, i32) {
    %c0_i32 = arith.constant 0 : i32
    %c0_i32_0 = arith.constant 0 : i32
    %c0_i32_1 = arith.constant 0 : i32
    return %c0_i32, %c0_i32_0 : i32, i32
  }
  func.func @transform_8(%arg0: i32) -> (i32, i32) {
    %c0_i32 = arith.constant 0 : i32
    %c0_i32_0 = arith.constant 0 : i32
    %c0_i32_1 = arith.constant 0 : i32
    return %c0_i32, %c0_i32_0 : i32, i32
  }
  func.func @transform_9(%arg0: i32) -> (i32, i32) {
    %c0_i32 = arith.constant 0 : i32
    %c0_i32_0 = arith.constant 0 : i32
    %c0_i32_1 = arith.constant 0 : i32
    return %c0_i32, %c0_i32_0 : i32, i32
  }
  func.func @transform_10(%arg0: i32) -> (i32, i32) {
    %c0_i32 = arith.constant 0 : i32
    %c0_i32_0 = arith.constant 0 : i32
    %c0_i32_1 = arith.constant 0 : i32
    return %c0_i32, %c0_i32_0 : i32, i32
  }
  func.func @transform_11(%arg0: i32) -> (i32, i32) {
    %c0_i32 = arith.constant 0 : i32
    %c0_i32_0 = arith.constant 0 : i32
    %c0_i32_1 = arith.constant 0 : i32
    return %c0_i32, %c0_i32_0 : i32, i32
  }
  func.func @transform_12(%arg0: i32) -> (i32, i32) {
    %c0_i32 = arith.constant 0 : i32
    %c0_i32_0 = arith.constant 0 : i32
    %c0_i32_1 = arith.constant 0 : i32
    return %c0_i32, %c0_i32_0 : i32, i32
  }
  func.func @transform_13(%arg0: i32) -> (i32, i32) {
    %c0_i32 = arith.constant 0 : i32
    %c0_i32_0 = arith.constant 0 : i32
    %c0_i32_1 = arith.constant 0 : i32
    return %c0_i32, %c0_i32_0 : i32, i32
  }
  func.func @transform_14(%arg0: i32) -> (i32, i32) {
    %c0_i32 = arith.constant 0 : i32
    %c0_i32_0 = arith.constant 0 : i32
    %c0_i32_1 = arith.constant 0 : i32
    return %c0_i32, %c0_i32_0 : i32, i32
  }
  func.func @transform_15(%arg0: i32) -> (i32, i32) {
    %c0_i32 = arith.constant 0 : i32
    %c0_i32_0 = arith.constant 0 : i32
    %c0_i32_1 = arith.constant 0 : i32
    return %c0_i32, %c0_i32_0 : i32, i32
  }
  func.func @transform_16(%arg0: i32) -> (i32, i32) {
    %c0_i32 = arith.constant 0 : i32
    %c0_i32_0 = arith.constant 0 : i32
    %c0_i32_1 = arith.constant 0 : i32
    return %c0_i32, %c0_i32_0 : i32, i32
  }
  func.func @transform_17(%arg0: i32) -> (i32, i32) {
    %c0_i32 = arith.constant 0 : i32
    %c0_i32_0 = arith.constant 0 : i32
    %c0_i32_1 = arith.constant 0 : i32
    return %c0_i32, %c0_i32_0 : i32, i32
  }
  func.func @transform_18(%arg0: i32) -> (i32, i32) {
    %c0_i32 = arith.constant 0 : i32
    %c0_i32_0 = arith.constant 0 : i32
    %c0_i32_1 = arith.constant 0 : i32
    return %c0_i32, %c0_i32_0 : i32, i32
  }
  func.func @transform_19(%arg0: i32) -> (i32, i32, i32) {
    %c0_i32 = arith.constant 0 : i32
    %c0_i32_0 = arith.constant 0 : i32
    %c0_i32_1 = arith.constant 0 : i32
    return %arg0, %c0_i32, %c0_i32_0 : i32, i32, i32
  }
}

</mosaic_0001>

<bundles_post_ra>
// kernel: decoder_layer_forward.1
= control target key start
LH: loop header
LB: loop body
LE: loop exit
PB: predicated region body
PF: predicated region fallthrough
CT: control target
= control target key end

     0   :  { %s2368_s0 = inlined_call_operand.vmem [shape: f32[2,8,32], index: 0, kind: input, shape index: {}]   ;;  %s2369_s1 = inlined_call_operand.vmem [shape: f32[2,8,32], index: 1, kind: input, shape index: {}]   ;;  %s2370_s2 = inlined_call_operand.vmem [shape: f32[2,8,8], index: 2, kind: input, shape index: {}]   ;;  %s2371_s3 = inlined_call_operand.vmem [shape: f32[2,8,8], index: 3, kind: input, shape index: {}]   ;;  %s2372_s4 = inlined_call_operand.vmem [shape: bf16[32,96], index: 4, kind: input, shape index: {}]   ;;  %s2373_s5 = inlined_call_operand.vmem [shape: f32[1,96], index: 5, kind: input, shape index: {}]   ;;  %s2374_s6 = inlined_call_operand.vmem [shape: bf16[32,32], index: 6, kind: input, shape index: {}]   ;;  %s2375_s7 = inlined_call_operand.vmem [shape: f32[1,32], index: 7, kind: input, shape index: {}]   ;;  %s2376_s8 = inlined_call_operand.vmem [shape: bf16[32,32], index: 8, kind: input, shape index: {}]   ;;  %s2377_s9 = inlined_call_operand.vmem [shape: f32[1,32], index: 9, kind: input, shape index: {}]   ;;  %s2378_s10 = inlined_call_operand.vmem [shape: bf16[32,64], index: 10, kind: input, shape index: {}]   ;;  %s2379_s11 = inlined_call_operand.vmem [shape: f32[1,64], index: 11, kind: input, shape index: {}]   ;;  %s2380_s12 = inlined_call_operand.vmem [shape: bf16[32,32], index: 12, kind: input, shape index: {}]   ;;  %s2381_s13 = inlined_call_operand.vmem [shape: f32[1,32], index: 13, kind: input, shape index: {}]   ;;  %s2382_s14 = inlined_call_operand.vmem [shape: bf16[32,64], index: 14, kind: input, shape index: {}]   ;;  %s2383_s15 = inlined_call_operand.vmem [shape: f32[1,64], index: 15, kind: input, shape index: {}]   ;;  %s2384_s16 = inlined_call_operand.vmem [shape: bf16[64,32], index: 16, kind: input, shape index: {}]   ;;  %s2385_s17 = inlined_call_operand.vmem [shape: f32[1,32], index: 17, kind: input, shape index: {}]   ;;  %s2386_s18 = inlined_call_operand.vmem [shape: f32[6,32], index: 18, kind: input, shape index: {}]   ;;  %s2387_s19 = inlined_call_operand.hbm [shape: f32[2,8,32], index: 19, kind: output, shape index: {}]  }
   0x1   :  { %2393 = sst [smem:[#allocation5_spill]] %s2368_s0 }
   0x2   :  { %2394 = sst [smem:[#allocation6_spill]] %s2369_s1 }
   0x3   :  { %2395 = sst [smem:[#allocation7_spill]] %s2370_s2 }
   0x4   :  { %2396 = sst [smem:[#allocation8_spill]] %s2371_s3 }
   0x5   :  { %v1663_v0 = vld [vmem:[%s2372_s4 + $0x8] sm:$0xff]  ;;  %v1662_v1 = vld [vmem:[%s2372_s4] sm:$0xff]  ;;  %s2397_s2 = sld [smem:[#allocation5_spill]] }
   0x6   :  { %97 = vmatpush.bf16.msra.mxu0 %v1663_v0 }
   0xb   :  { %v1970_v2 = vld [vmem:[%s2397_s2] sm:$0xff]  ;;  %v1975_v3 = vld [vmem:[%s2397_s2 + $0x8] sm:$0xff] }
   0xc   :  { %v66_v4 = vpack.c.bf16 %v1975_v3, %v1970_v2 }
   0xd   :  { %24 = vsyncpa [#allocation3], 0  ;;  %98 = vmatpush.bf16.msra.mxu0 %v1662_v1  ;;  %vm87_vm0 = vcmask 261120   ;;  %v1726_v5 = vld [vmem:[%s2373_s5] ss:$0 sm:$0xff]  ;;  %s1843_s3 = smov 120  }
   0xe   :  { %s1844_s26 = smov 88   ;;  %s1845_s27 = smov 96   ;;  %vm118_vm1 = vcmask 64512   ;;  %v1850_v40 = vmov 0.0   ;;  %vm195_vm4 = vcmask 1043456   ;;  %vm607_vm5 = vcmask 130048  }
   0xf   :  { %s1846_s5 = smov 112   ;;  %s1847_s28 = smov 80   ;;  %vm610_vm6 = vcmask 195584  }
  0x10   :  { %1567 = vmatmul.msk.bf16.vlgmr.msra.gmra.mxu0 %vm87_vm0, %v66_v4  ;;  %s1848_s29 = smov 72   ;;  %s1849_s0 = smov 104  }
  0x11   :  { %s2398_s21 = sld [smem:[#allocation7_spill]]  ;;  %s1851_s2 = smov 64  }
  0x12   :  { %s1852_s23 = smov 56   ;;  %s1853_s24 = smov 48  }
  0x13   :  { %s1854_s4 = smov 40   ;;  %s1855_s25 = smov 8  }
  0x14   :  { %s1856_s30 = smov 16   ;;  %s2392_s20 = smov 24  }
  0x17   :  { %v105_v38 = vld [vmem:[%s2398_s21] sm:$0xff]  ;;  %v106_v51 = vld [vmem:[%s2398_s21 + $0x8] sm:$0xff] }
  0x18   :  { %vm109_vm2 = vcmp.eq.f32.partialorder %v105_v38, 0.0  ;;  %vm110_vm3 = vcmp.eq.f32.partialorder %v106_v51, 0.0 }
  0x19   :  { %v111_v41 = vsel %vm109_vm2, -10000.0, %v1850_v40  ;;  %v112_v53 = vsel %vm110_vm3, -10000.0, %v1850_v40 }
  0x8d   :  { %v100_v6 = vpop.f32.mrf.mxu0 }
  0x8e   :  { %v101_v7 = vadd.f32 %v1726_v5, %v100_v6 }
  0x90   :  { %v107_v8 = vpack.c.bf16 %v101_v7, %v101_v7 }
  0x92   :  { %v114_v9 = vunpack.c.l.b16 %v107_v8 }
  0x94   :  { %v1983_v10 = vpack.c.b16 %v114_v9, %v114_v9 }
  0x95   :  { %v102_v11 = vpop.f32.mrf.mxu0 }
  0x96   :  { %v103_v12 = vadd.f32 %v1726_v5, %v102_v11  ;;  %233 = vrot.lane.b32.xlu2 %v1983_v10, %s1843_s3  ;;  %235 = vrot.lane.b32.xlu1 %v1983_v10, %s1844_s26 }
  0x97   :  { %116 = vrot.lane.b32.xlu0 %v1983_v10, %s1845_s27 }
  0x98   :  { %v108_v13 = vpack.c.bf16 %v103_v12, %v103_v12 }
  0x9a   :  { %v139_v14 = vunpack.c.l.b16 %v108_v13 }
  0x9c   :  { %v1991_v15 = vpack.c.b16 %v139_v14, %v139_v14 }
  0x9e   :  { %256 = vrot.lane.b32.xlu2 %v1991_v15, %s1843_s3  ;;  %258 = vrot.lane.b32.xlu1 %v1991_v15, %s1844_s26 }
  0x9f   :  { %141 = vrot.lane.b32.xlu0 %v1991_v15, %s1845_s27 }
  0xa6   :  { %349 = vrot.lane.b32.xlu2 %v1983_v10, %s1846_s5  ;;  %374 = vrot.lane.b32.xlu1 %v1991_v15, %s1847_s28 }
  0xa7   :  { %351 = vrot.lane.b32.xlu0 %v1983_v10, %s1847_s28 }
  0xae   :  { %490 = vrot.lane.b32.xlu2 %v1991_v15, %s1848_s29  ;;  %467 = vrot.lane.b32.xlu1 %v1983_v10, %s1848_s29 }
  0xaf   :  { %372 = vrot.lane.b32.xlu0 %v1991_v15, %s1846_s5 }
  0xb6   :  { %488 = vrot.lane.b32.xlu1 %v1991_v15, %s1849_s0 }
  0xb7   :  { %465 = vrot.lane.b32.xlu0 %v1983_v10, %s1849_s0 }
  0xf0   :  { %v234_v16 = vpop.permute.xlu2 %233 }
  0xf8   :  { %v257_v21 = vpop.permute.xlu2 %256 }
 0x100   :  { %v350_v26 = vpop.permute.xlu2 %349 }
 0x108   :  { %v236_v17 = vpop.permute.xlu1 %235  ;;  %v491_v31 = vpop.permute.xlu2 %490 }
 0x109   :  { %v117_v18 = vpop.permute.xlu0 %116  ;;  %v241_v19 = vsel %vm118_vm1, %v236_v17, 0  ;;  %v496_v34 = vsel %vm118_vm1, %v491_v31, 0 }
 0x10a   :  { %v123_v20 = vsel %vm118_vm1, %v117_v18, 0  ;;  %250 = vmatpush.bf16.xpose.msrb.mxu0 %v241_v19 }
 0x10b   :  { %132 = vmatpush.bf16.xpose.msra.mxu1 %v123_v20 }
 0x110   :  { %v259_v22 = vpop.permute.xlu1 %258 }
 0x111   :  { %v142_v23 = vpop.permute.xlu0 %141  ;;  %1572 = vmatmul.msk.bf16.vlgmr.msrb.gmra.mxu0 %vm118_vm1, %v234_v16  ;;  %v264_v24 = vsel %vm118_vm1, %v259_v22, 0 }
 0x112   :  { %1568 = vmatmul.msk.bf16.vlgmr.msra.gmra.mxu1 %vm118_vm1, %v107_v8  ;;  %v147_v25 = vsel %vm118_vm1, %v142_v23, 0 }
 0x113   :  { %156 = vmatpush.bf16.xpose.msra.mxu2 %v147_v25  ;;  %273 = vmatpush.bf16.xpose.msrb.mxu1 %v264_v24 }
 0x118   :  { %v375_v27 = vpop.permute.xlu1 %374 }
 0x119   :  { %v380_v28 = vsel %vm118_vm1, %v375_v27, 0  ;;  %v352_v29 = vpop.permute.xlu0 %351 }
 0x11a   :  { %v357_v30 = vsel %vm118_vm1, %v352_v29, 0  ;;  %1569 = vmatmul.msk.bf16.vlgmr.msra.gmra.mxu2 %vm118_vm1, %v108_v13 }
 0x11b   :  { %389 = vmatpush.bf16.xpose.msra.mxu1 %v380_v28  ;;  %366 = vmatpush.bf16.xpose.msra.mxu0 %v357_v30 }
 0x120   :  { %v468_v32 = vpop.permute.xlu1 %467 }
 0x121   :  { %v473_v33 = vsel %vm118_vm1, %v468_v32, 0  ;;  %v373_v35 = vpop.permute.xlu0 %372 }
 0x122   :  { %1573 = vmatmul.msk.bf16.vlgmr.msrb.gmra.mxu1 %vm118_vm1, %v257_v21  ;;  %1576 = vmatmul.msk.bf16.vlgmr.msra.gmra.mxu0 %vm118_vm1, %v350_v26 }
 0x123   :  { %505 = vmatpush.bf16.xpose.msrb.mxu1 %v496_v34  ;;  %482 = vmatpush.bf16.xpose.msrb.mxu0 %v473_v33 }
 0x128   :  { %v489_v37 = vpop.permute.xlu1 %488 }
 0x129   :  { %v466_v36 = vpop.permute.xlu0 %465 }
 0x132   :  { %1577 = vmatmul.msk.bf16.vlgmr.msra.gmra.mxu1 %vm118_vm1, %v373_v35  ;;  %1580 = vmatmul.msk.bf16.vlgmr.msrb.gmra.mxu0 %vm118_vm1, %v466_v36 }
 0x142   :  { %1581 = vmatmul.msk.bf16.vlgmr.msrb.gmra.mxu1 %vm118_vm1, %v489_v37 }
 0x18e   :  { %v252_v39 = vpop.f32.mrf.mxu0 }
 0x18f   :  { %v134_v42 = vpop.f32.mrf.mxu1  ;;  %v279_v43 = vmul.f32 0.35355338, %v252_v39 }
 0x190   :  { %v162_v44 = vmul.f32 0.35355338, %v134_v42 }
 0x191   :  { %v281_v45 = vadd.f32 %v279_v43, %v111_v41 }
 0x192   :  { %v164_v46 = vadd.f32 %v162_v44, %v111_v41 }
 0x193   :  { %v283_v47 = vsel %vm118_vm1, %v281_v45, -inf }
 0x194   :  { %284 = vmax.xlane.f32.xlu1 %v283_v47  ;;  %v166_v48 = vsel %vm118_vm1, %v164_v46, -inf }
 0x195   :  { %167 = vmax.xlane.f32.xlu2 %v166_v48 }
 0x196   :  { %v254_v49 = vpop.f32.mrf.mxu0 }
 0x197   :  { %v136_v50 = vpop.f32.mrf.mxu1 }
 0x19d   :  { %v158_v52 = vpop.f32.mrf.mxu2 }
 0x19e   :  { %v163_v54 = vmul.f32 0.35355338, %v158_v52 }
 0x19f   :  { %v275_v55 = vpop.f32.mrf.mxu1  ;;  %v368_v56 = vpop.f32.mrf.mxu0 }
 0x1a0   :  { %v280_v57 = vmul.f32 0.35355338, %v275_v55  ;;  %v395_v58 = vmul.f32 0.35355338, %v368_v56  ;;  %v165_v59 = vadd.f32 %v163_v54, %v112_v53 }
 0x1a2   :  { %v169_v60 = vsel %vm118_vm1, %v165_v59, -inf  ;;  %v282_v61 = vadd.f32 %v280_v57, %v112_v53  ;;  %v2042_v62 = vadd.f32 %v395_v58, %v111_v41 }
 0x1a3   :  { %170 = vmax.xlane.f32.xlu0 %v169_v60 }
 0x1a4   :  { %v286_v63 = vsel %vm118_vm1, %v282_v61, -inf  ;;  %v399_v21 = vsel %vm118_vm1, %v2042_v62, -inf }
 0x1a5   :  { %287 = vmax.xlane.f32.xlu2 %v286_v63  ;;  %v160_v0 = vpop.f32.mrf.mxu2 }
 0x1a7   :  { %v277_v1 = vpop.f32.mrf.mxu1  ;;  %v370_v4 = vpop.f32.mrf.mxu0 }
 0x1ad   :  { %212 = vrot.lane.b32.xlu1 %v1991_v15, %s1851_s2 }
 0x1af   :  { %v391_v5 = vpop.f32.mrf.mxu1  ;;  %v484_v6 = vpop.f32.mrf.mxu0 }
 0x1b0   :  { %v396_v13 = vmul.f32 0.35355338, %v391_v5  ;;  %v511_v18 = vmul.f32 0.35355338, %v484_v6 }
 0x1b2   :  { %v398_v16 = vadd.f32 %v396_v13, %v112_v53  ;;  %v513_v20 = vadd.f32 %v511_v18, %v111_v41 }
 0x1b4   :  { %v402_v19 = vsel %vm118_vm1, %v398_v16, -inf  ;;  %v515_v22 = vsel %vm118_vm1, %v513_v20, -inf }
 0x1b5   :  { %328 = vrot.lane.b32.xlu1 %v1991_v15, %s1852_s23 }
 0x1b7   :  { %307 = vrot.lane.b32.xlu0 %v1983_v10, %s1852_s23  ;;  %v393_v7 = vpop.f32.mrf.mxu1  ;;  %v486_v8 = vpop.f32.mrf.mxu0 }
 0x1bd   :  { %190 = vrot.lane.b32.xlu2 %v1983_v10, %s1851_s2  ;;  %s2399_s2 = sld [smem:[#allocation6_spill]] }
 0x1bf   :  { %v507_v9 = vpop.f32.mrf.mxu1 }
 0x1c0   :  { %v512_v12 = vmul.f32 0.35355338, %v507_v9 }
 0x1c2   :  { %v514_v14 = vadd.f32 %v512_v12, %v112_v53 }
 0x1c4   :  { %v518_v17 = vsel %vm118_vm1, %v514_v14, -inf }
 0x1c7   :  { %v509_v11 = vpop.f32.mrf.mxu1 }
 0x1df   :  { %519 = vmax.xlane.f32.xlu1 %v518_v17 }
 0x1e1   :  { %403 = vmax.xlane.f32.xlu0 %v402_v19 }
 0x1e6   :  { %400 = vmax.xlane.f32.xlu2 %v399_v21 }
 0x1e9   :  { %516 = vmax.xlane.f32.xlu0 %v515_v22 }
 0x207   :  { %v285_v23 = vpop.xlane.xlu1 %284 }
 0x208   :  { %v289_v24 = vsub.f32 %v281_v45, %v285_v23  ;;  %v168_v25 = vpop.xlane.xlu2 %167 }
 0x209   :  { %v172_v26 = vsub.f32 %v164_v46, %v168_v25 }
 0x20a   :  { %v291_v27 = vmul.f32 1.442695, %v289_v24 }
 0x20b   :  { %v174_v28 = vmul.f32 1.442695, %v172_v26 }
 0x20c   :  { %1739 = vpow2.f32 %v291_v27 }
 0x20d   :  { %1741 = vpow2.f32 %v174_v28 }
 0x212   :  { %v2054_v29 = vpop.eup %1739 }
 0x213   :  { %v2056_v30 = vpop.eup %1741  ;;  %v295_v31 = vsel %vm118_vm1, %v2054_v29, 0.0 }
 0x214   :  { %v178_v32 = vsel %vm118_vm1, %v2056_v30, 0.0  ;;  %296 = vadd.xlane.f32.xlu0 %v295_v31 }
 0x215   :  { %179 = vadd.xlane.f32.xlu1 %v178_v32 }
 0x216   :  { %v171_v33 = vpop.xlane.xlu0 %170 }
 0x217   :  { %v173_v34 = vsub.f32 %v165_v59, %v171_v33 }
 0x218   :  { %v288_v35 = vpop.xlane.xlu2 %287 }
 0x219   :  { %v176_v36 = vmul.f32 1.442695, %v173_v34  ;;  %v290_v37 = vsub.f32 %v282_v61, %v288_v35 }
 0x21b   :  { %1743 = vpow2.f32 %v176_v36  ;;  %v293_v38 = vmul.f32 1.442695, %v290_v37 }
 0x21d   :  { %1745 = vpow2.f32 %v293_v38 }
 0x21f   :  { %v213_v39 = vpop.permute.xlu1 %212 }
 0x220   :  { %v191_v41 = vpop.permute.xlu2 %190  ;;  %v218_v42 = vsel %vm195_vm4, %v213_v39, 0 }
 0x221   :  { %v2063_v43 = vpop.eup %1743  ;;  %v197_v44 = vsel %vm195_vm4, %v191_v41, 0 }
 0x222   :  { %206 = vmatpush.bf16.msra.mxu3 %v197_v44  ;;  %v181_v45 = vsel %vm118_vm1, %v2063_v43, 0.0 }
 0x223   :  { %v2068_v46 = vpop.eup %1745  ;;  %182 = vadd.xlane.f32.xlu0 %v181_v45 }
 0x224   :  { %v298_v47 = vsel %vm118_vm1, %v2068_v46, 0.0 }
 0x225   :  { %299 = vadd.xlane.f32.xlu2 %v298_v47 }
 0x226   :  { %227 = vmatpush.bf16.msrb.mxu3 %v218_v42 }
 0x227   :  { %v329_v50 = vpop.permute.xlu1 %328 }
 0x228   :  { %v334_v19 = vsel %vm195_vm4, %v329_v50, 0 }
 0x229   :  { %v308_v48 = vpop.permute.xlu0 %307 }
 0x22a   :  { %v313_v49 = vsel %vm195_vm4, %v308_v48, 0 }
 0x22b   :  { %322 = vmatpush.bf16.msrb.mxu2 %v313_v49 }
 0x22e   :  { %444 = vrot.lane.b32.xlu1 %v1991_v15, %s1853_s24 }
 0x23d   :  { %423 = vrot.lane.b32.xlu2 %v1983_v10, %s1853_s24 }
 0x252   :  { %v520_v51 = vpop.xlane.xlu1 %519 }
 0x253   :  { %v522_v52 = vsub.f32 %v514_v14, %v520_v51 }
 0x254   :  { %v404_v53 = vpop.xlane.xlu0 %403 }
 0x255   :  { %v406_v54 = vsub.f32 %v398_v16, %v404_v53  ;;  %v525_v56 = vmul.f32 1.442695, %v522_v52 }
 0x257   :  { %v409_v55 = vmul.f32 1.442695, %v406_v54 }
 0x259   :  { %1747 = vpow2.f32 %v409_v55  ;;  %v401_v57 = vpop.xlane.xlu2 %400 }
 0x25a   :  { %v405_v58 = vsub.f32 %v2042_v62, %v401_v57  ;;  %1749 = vpow2.f32 %v525_v56 }
 0x25c   :  { %v407_v59 = vmul.f32 1.442695, %v405_v58  ;;  %v517_v60 = vpop.xlane.xlu0 %516 }
 0x25d   :  { %v521_v61 = vsub.f32 %v513_v20, %v517_v60 }
 0x25e   :  { %1751 = vpow2.f32 %v407_v59 }
 0x25f   :  { %v1748_v63 = vpop.eup %1747  ;;  %v523_v0 = vmul.f32 1.442695, %v521_v61 }
 0x260   :  { %v414_v1 = vsel %vm118_vm1, %v1748_v63, 0.0  ;;  %v2077_v4 = vpop.eup %1749 }
 0x261   :  { %1753 = vpow2.f32 %v523_v0  ;;  %415 = vadd.xlane.f32.xlu0 %v414_v1  ;;  %v530_v7 = vsel %vm118_vm1, %v2077_v4, 0.0 }
 0x264   :  { %v1752_v5 = vpop.eup %1751 }
 0x265   :  { %v411_v6 = vsel %vm118_vm1, %v1752_v5, 0.0 }
 0x266   :  { %412 = vadd.xlane.f32.xlu1 %v411_v6  ;;  %531 = vadd.xlane.f32.xlu2 %v530_v7 }
 0x267   :  { %v1754_v62 = vpop.eup %1753 }
 0x268   :  { %v527_v8 = vsel %vm118_vm1, %v1754_v62, 0.0 }
 0x269   :  { %528 = vadd.xlane.f32.xlu0 %v527_v8  ;;  %v1665_v8 = vld [vmem:[%s2374_s6 + $0x8] sm:$0xff] }
 0x26a   :  { %643 = vmatpush.bf16.msra.mxu0 %v1665_v8 }
 0x27d   :  { %539 = vrot.lane.b32.xlu0 %v1983_v10, %s1854_s4 }
 0x27f   :  { %560 = vrot.lane.b32.xlu1 %v1991_v15, %s1854_s4 }
 0x287   :  { %v297_v9 = vpop.xlane.xlu0 %296 }
 0x288   :  { %v180_v11 = vpop.xlane.xlu1 %179  ;;  %1755 = vrcp.f32 %v297_v9  ;;  %v1664_v9 = vld [vmem:[%s2374_s6] sm:$0xff] }
 0x289   :  { %1757 = vrcp.f32 %v180_v11  ;;  %644 = vmatpush.bf16.msra.mxu0 %v1664_v9 }
 0x28e   :  { %v1756_v12 = vpop.eup %1755 }
 0x28f   :  { %v1758_v13 = vpop.eup %1757  ;;  %v303_v14 = vmul.f32 %v1756_v12, %v2054_v29 }
 0x290   :  { %v186_v16 = vmul.f32 %v1758_v13, %v2056_v30 }
 0x291   :  { %v305_v17 = vpack.c.bf16 %v303_v14, %v303_v14 }
 0x292   :  { %v188_v18 = vpack.c.bf16 %v186_v16, %v186_v16 }
 0x293   :  { %1574 = vmatmul.msk.bf16.vlgmr.msrb.gmra.mxu2 %vm118_vm1, %v305_v17 }
 0x294   :  { %1570 = vmatmul.msk.bf16.vlgmr.msra.gmra.mxu3 %vm118_vm1, %v188_v18 }
 0x295   :  { %343 = vmatpush.bf16.msra.mxu3 %v334_v19 }
 0x296   :  { %v183_v10 = vpop.xlane.xlu0 %182 }
 0x297   :  { %1759 = vrcp.f32 %v183_v10 }
 0x298   :  { %v300_v15 = vpop.xlane.xlu2 %299 }
 0x299   :  { %1761 = vrcp.f32 %v300_v15 }
 0x29d   :  { %v1760_v20 = vpop.eup %1759 }
 0x29e   :  { %v187_v21 = vmul.f32 %v1760_v20, %v2063_v43 }
 0x29f   :  { %v1762_v27 = vpop.eup %1761 }
 0x2a0   :  { %v424_v22 = vpop.permute.xlu2 %423  ;;  %v445_v24 = vpop.permute.xlu1 %444  ;;  %v189_v25 = vpack.c.bf16 %v187_v21, %v187_v21  ;;  %v304_v28 = vmul.f32 %v1762_v27, %v2068_v46 }
 0x2a1   :  { %v429_v23 = vsel %vm195_vm4, %v424_v22, 0  ;;  %v450_v26 = vsel %vm195_vm4, %v445_v24, 0 }
 0x2a2   :  { %438 = vmatpush.bf16.msra.mxu2 %v429_v23  ;;  %v306_v29 = vpack.c.bf16 %v304_v28, %v304_v28 }
 0x2a4   :  { %1571 = vmatmul.msk.bf16.vlgmr.msrb.gmra.mxu3 %vm118_vm1, %v189_v25 }
 0x2a5   :  { %459 = vmatpush.bf16.msrb.mxu3 %v450_v26  ;;  %v1727_v26 = vld [vmem:[%s2375_s7] ss:$0 sm:$0xff] }
 0x2b4   :  { %1575 = vmatmul.msk.bf16.vlgmr.msra.gmra.mxu3 %vm118_vm1, %v306_v29 }
 0x2d4   :  { %v416_v30 = vpop.xlane.xlu0 %415 }
 0x2d5   :  { %1763 = vrcp.f32 %v416_v30 }
 0x2d9   :  { %v413_v31 = vpop.xlane.xlu1 %412  ;;  %v532_v37 = vpop.xlane.xlu2 %531 }
 0x2da   :  { %1765 = vrcp.f32 %v413_v31 }
 0x2db   :  { %v1764_v32 = vpop.eup %1763  ;;  %1767 = vrcp.f32 %v532_v37 }
 0x2dc   :  { %v420_v33 = vmul.f32 %v1764_v32, %v1748_v63  ;;  %v529_v39 = vpop.xlane.xlu0 %528 }
 0x2dd   :  { %1769 = vrcp.f32 %v529_v39 }
 0x2de   :  { %v422_v34 = vpack.c.bf16 %v420_v33, %v420_v33 }
 0x2e0   :  { %1579 = vmatmul.msk.bf16.vlgmr.msrb.gmra.mxu3 %vm118_vm1, %v422_v34  ;;  %v1766_v35 = vpop.eup %1765 }
 0x2e1   :  { %v419_v36 = vmul.f32 %v1766_v35, %v1752_v5  ;;  %v1768_v41 = vpop.eup %1767  ;;  %v1858_v35 = vmov 32.0  }
 0x2e2   :  { %v536_v44 = vmul.f32 %v1768_v41, %v2077_v4  ;;  %1771 = vrcp.f32 %v1858_v35 }
 0x2e3   :  { %v421_v38 = vpack.c.bf16 %v419_v36, %v419_v36  ;;  %v1770_v42 = vpop.eup %1769 }
 0x2e4   :  { %v535_v45 = vmul.f32 %v1770_v42, %v1754_v62  ;;  %v538_v49 = vpack.c.bf16 %v536_v44, %v536_v44 }
 0x2e5   :  { %1578 = vmatmul.msk.bf16.vlgmr.msra.gmra.mxu2 %vm118_vm1, %v421_v38 }
 0x2e6   :  { %v537_v50 = vpack.c.bf16 %v535_v45, %v535_v45 }
 0x2e8   :  { %v1772_v36 = vpop.eup %1771 }
 0x2e9   :  { %v662_v37 = vmul.f32 32.0, %v1772_v36  ;;  %vm666_vm7 = vweird.f32 %v1772_v36 }
 0x2eb   :  { %v663_v38 = vsub.f32 1.0, %v662_v37 }
 0x2ed   :  { %v664_v39 = vmul.f32 %v1772_v36, %v663_v38  ;;  %v1731_v38 = vld [vmem:[%s2377_s9] ss:$0 sm:$0xff] }
 0x2ef   :  { %v540_v43 = vpop.permute.xlu0 %539  ;;  %v665_v41 = vadd.f32 %v1772_v36, %v664_v39 }
 0x2f0   :  { %v545_v46 = vsel %vm195_vm4, %v540_v43, 0 }
 0x2f1   :  { %v561_v47 = vpop.permute.xlu1 %560  ;;  %554 = vmatpush.bf16.msrb.mxu2 %v545_v46  ;;  %v2126_v42 = vsel %vm666_vm7, %v1772_v36, %v665_v41  ;;  %vm1467_vm7 = vcmask 523264  }
 0x2f2   :  { %v566_v48 = vsel %vm195_vm4, %v561_v47, 0 }
 0x2f3   :  { %575 = vmatpush.bf16.msra.mxu3 %v566_v48 }
 0x2f5   :  { %1582 = vmatmul.msk.bf16.vlgmr.msrb.gmra.mxu2 %vm118_vm1, %v537_v50 }
 0x2f6   :  { %1583 = vmatmul.msk.bf16.vlgmr.msra.gmra.mxu3 %vm118_vm1, %v538_v49 }
 0x316   :  { %v324_v51 = vpop.f32.mrf.mxu2 }
 0x317   :  { %v208_v52 = vpop.f32.mrf.mxu3 }
 0x31e   :  { %v326_v53 = vpop.f32.mrf.mxu2 }
 0x31f   :  { %v210_v54 = vpop.f32.mrf.mxu3  ;;  %v712_v53 = vld [vmem:[%s2399_s2] sm:$0xff] }
 0x320   :  { %v713_v54 = vld [vmem:[%s2399_s2 + $0x8] sm:$0xff] }
 0x327   :  { %v229_v55 = vpop.f32.mrf.mxu3 }
 0x32f   :  { %v231_v56 = vpop.f32.mrf.mxu3 }
 0x330   :  { %v1667_v56 = vld [vmem:[%s2376_s8 + $0x8] sm:$0xff] }
 0x331   :  { %744 = vmatpush.bf16.msra.mxu1 %v1667_v56 }
 0x337   :  { %v345_v57 = vpop.f32.mrf.mxu3 }
 0x338   :  { %v1696_v58 = vpack.i.bf16 %v345_v57, %v324_v51  ;;  %v1669_v51 = vld [vmem:[%s2378_s10 + $0x8] sm:$0xff] }
 0x339   :  { %782 = vmatpush.bf16.msra.mxu2 %v1669_v51 }
 0x33a   :  { %1697 = vrot.lane.b32.xlu0 %v1696_v58, %s1855_s25 }
 0x33f   :  { %v347_v59 = vpop.f32.mrf.mxu3 }
 0x363   :  { %v461_v60 = vpop.f32.mrf.mxu3 }
 0x368   :  { %v440_v61 = vpop.f32.mrf.mxu2 }
 0x369   :  { %v1701_v63 = vpack.i.bf16 %v461_v60, %v440_v61  ;;  %v1666_v60 = vld [vmem:[%s2376_s8] sm:$0xff] }
 0x36a   :  { %745 = vmatpush.bf16.msra.mxu1 %v1666_v60 }
 0x36b   :  { %v463_v0 = vpop.f32.mrf.mxu3  ;;  %1702 = vrot.lane.b32.xlu1 %v1701_v63, %s1856_s30 }
 0x370   :  { %v442_v1 = vpop.f32.mrf.mxu2 }
 0x378   :  { %v556_v4 = vpop.f32.mrf.mxu2 }
 0x379   :  { %v577_v5 = vpop.f32.mrf.mxu3 }
 0x37a   :  { %v1706_v6 = vpack.i.bf16 %v577_v5, %v556_v4 }
 0x37c   :  { %1707 = vrot.lane.b32.xlu0 %v1706_v6, %s2392_s20 }
 0x380   :  { %v558_v7 = vpop.f32.mrf.mxu2 }
 0x381   :  { %v579_v62 = vpop.f32.mrf.mxu3 }
 0x3ac   :  { %v1698_v11 = vpop.permute.xlu0 %1697 }
 0x3ad   :  { %v1700_v13 = vunpack.i.h.bf16 %v1698_v11  ;;  %v1699_v14 = vunpack.i.l.bf16 %v1698_v11 }
 0x3af   :  { %v606_v19 = vsel %vm118_vm1, %v229_v55, %v1700_v13  ;;  %v605_v10 = vsel %vm118_vm1, %v208_v52, %v1699_v14  ;;  %v1668_v52 = vld [vmem:[%s2378_s10] sm:$0xff]  ;;  %v752_v55 = vpack.c.bf16 %v713_v54, %v712_v53 }
 0x3b0   :  { %783 = vmatpush.bf16.msra.mxu2 %v1668_v52 }
 0x3b3   :  { %1610 = vmatmul.msk.bf16.vlgmr.msra.gmra.mxu2 %vm87_vm0, %v752_v55 }
 0x3dd   :  { %v1703_v12 = vpop.permute.xlu1 %1702 }
 0x3de   :  { %v1705_v16 = vunpack.i.h.bf16 %v1703_v12  ;;  %v1704_v17 = vunpack.i.l.bf16 %v1703_v12 }
 0x3e0   :  { %v608_v21 = vsel %vm607_vm5, %v605_v10, %v1704_v17  ;;  %v609_v22 = vsel %vm607_vm5, %v606_v19, %v1705_v16  ;;  %v1728_v16 = vld [vmem:[%s2386_s18] ss:$0 sm:$0xff]  ;;  %v1729_v10 = vld [vmem:[%s2386_s18 + $0x1] ss:$0 sm:$0xff] }
 0x3ee   :  { %v1708_v18 = vpop.permute.xlu0 %1707 }
 0x3ef   :  { %v1710_v15 = vunpack.i.h.bf16 %v1708_v18  ;;  %v1709_v20 = vunpack.i.l.bf16 %v1708_v18 }
 0x3f1   :  { %v611_v23 = vsel %vm610_vm6, %v608_v21, %v1709_v20  ;;  %v612_v24 = vsel %vm610_vm6, %v609_v22, %v1710_v15 }
 0x3f2   :  { %v613_v25 = vpack.c.bf16 %v612_v24, %v611_v23 }
 0x3f4   :  { %1592 = vmatmul.msk.bf16.vlgmr.msra.gmra.mxu0 %vm87_vm0, %v613_v25  ;;  %v1730_v25 = vld [vmem:[%s2379_s11] ss:$0 sm:$0xff] }
 0x471   :  { %v646_v27 = vpop.f32.mrf.mxu0 }
 0x472   :  { %v647_v28 = vadd.f32 %v1727_v26, %v646_v27 }
 0x474   :  { %v653_v29 = vadd.f32 %v647_v28, %v1970_v2 }
 0x476   :  { %v655_v30 = vsel %vm87_vm0, %v653_v29, 0.0 }
 0x477   :  { %656 = vadd.xlane.f32.xlu1 %v655_v30 }
 0x479   :  { %v648_v31 = vpop.f32.mrf.mxu0 }
 0x47a   :  { %v649_v32 = vadd.f32 %v1727_v26, %v648_v31  ;;  %v785_v26 = vpop.f32.mrf.mxu2 }
 0x47b   :  { %v786_v27 = vadd.f32 %v1730_v25, %v785_v26 }
 0x47c   :  { %v654_v33 = vadd.f32 %v649_v32, %v1975_v3 }
 0x47d   :  { %v794_v28 = vpack.c.bf16 %v786_v27, %v786_v27 }
 0x47e   :  { %v658_v34 = vsel %vm87_vm0, %v654_v33, 0.0 }
 0x47f   :  { %659 = vadd.xlane.f32.xlu2 %v658_v34  ;;  %v867_v30 = vunpack.c.l.b16 %v794_v28 }
 0x481   :  { %v2170_v31 = vpack.c.b16 %v867_v30, %v867_v30 }
 0x482   :  { %v787_v32 = vpop.f32.mrf.mxu2 }
 0x4ea   :  { %v657_v2 = vpop.xlane.xlu1 %656 }
 0x4eb   :  { %v668_v43 = vmul.f32 %v2126_v42, %v657_v2 }
 0x4ed   :  { %v670_v44 = vsub.f32 %v653_v29, %v668_v43  ;;  %v804_v29 = vsel %vm118_vm1, %v794_v28, 0 }
 0x4ee   :  { %813 = vmatpush.bf16.xpose.msrb.mxu3 %v804_v29 }
 0x4ef   :  { %v672_v45 = vmul.f32 %v670_v44, %v670_v44 }
 0x4f1   :  { %v674_v3 = vsel %vm87_vm0, %v672_v45, 0.0 }
 0x4f2   :  { %v660_v46 = vpop.xlane.xlu2 %659  ;;  %675 = vadd.xlane.f32.xlu0 %v674_v3 }
 0x4f3   :  { %v669_v47 = vmul.f32 %v2126_v42, %v660_v46 }
 0x4f5   :  { %v671_v48 = vsub.f32 %v654_v33, %v669_v47  ;;  %v788_v33 = vadd.f32 %v1730_v25, %v787_v32 }
 0x4f7   :  { %v673_v49 = vmul.f32 %v671_v48, %v671_v48  ;;  %v795_v34 = vpack.c.bf16 %v788_v33, %v788_v33 }
 0x4f9   :  { %v677_v50 = vsel %vm87_vm0, %v673_v49, 0.0  ;;  %v823_v35 = vsel %vm118_vm1, %v795_v34, 0  ;;  %v891_v36 = vunpack.c.l.b16 %v795_v34 }
 0x4fa   :  { %678 = vadd.xlane.f32.xlu2 %v677_v50  ;;  %832 = vmatpush.bf16.xpose.msrb.mxu0 %v823_v35 }
 0x4fb   :  { %v2175_v37 = vpack.c.b16 %v891_v36, %v891_v36 }
 0x4fd   :  { %945 = vrot.lane.b32.xlu1 %v2175_v37, %s1843_s3 }
 0x512   :  { %919 = vrot.lane.b32.xlu2 %v2170_v31, %s1843_s3 }
 0x565   :  { %v676_v57 = vpop.xlane.xlu0 %675 }
 0x566   :  { %v680_v58 = vmul.f32 %v676_v57, %v2126_v42 }
 0x568   :  { %v682_v59 = vadd.f32 1e-05, %v680_v58 }
 0x56a   :  { %1773 = vrsqrt.f32 %v682_v59  ;;  %vm690_vm9 = vweird.f32 %v682_v59 }
 0x56d   :  { %v679_v61 = vpop.xlane.xlu2 %678 }
 0x56e   :  { %v681_v63 = vmul.f32 %v679_v61, %v2126_v42 }
 0x56f   :  { %v946_v51 = vpop.permute.xlu1 %945 }
 0x570   :  { %v1774_v0 = vpop.eup %1773  ;;  %v683_v1 = vadd.f32 1e-05, %v681_v63  ;;  %v951_v52 = vsel %vm118_vm1, %v946_v51, 0 }
 0x571   :  { %v685_v4 = vmul.f32 %v1774_v0, %v682_v59  ;;  %vm691_vm8 = vweird.f32 %v1774_v0  ;;  %960 = vmatpush.bf16.xpose.msra.mxu0 %v951_v52 }
 0x572   :  { %1775 = vrsqrt.f32 %v683_v1  ;;  %vm692_vm10 = vmor %vm690_vm9, %vm691_vm8  ;;  %vm700_vm12 = vweird.f32 %v683_v1 }
 0x573   :  { %v686_v5 = vmul.f32 %v1774_v0, %v685_v4 }
 0x575   :  { %v687_v6 = vmul.f32 0.5, %v686_v5  ;;  %v920_v49 = vpop.permute.xlu2 %919 }
 0x576   :  { %v925_v50 = vsel %vm118_vm1, %v920_v49, 0 }
 0x577   :  { %v688_v7 = vsub.f32 1.5, %v687_v6  ;;  %934 = vmatpush.bf16.xpose.msra.mxu3 %v925_v50 }
 0x578   :  { %v1776_v62 = vpop.eup %1775 }
 0x579   :  { %v689_v8 = vmul.f32 %v1774_v0, %v688_v7  ;;  %v695_v9 = vmul.f32 %v1776_v62, %v683_v1  ;;  %vm701_vm11 = vweird.f32 %v1776_v62 }
 0x57a   :  { %vm702_vm13 = vmor %vm700_vm12, %vm701_vm11 }
 0x57b   :  { %v696_v11 = vmul.f32 %v1776_v62, %v695_v9  ;;  %v693_v12 = vsel %vm692_vm10, %v1774_v0, %v689_v8 }
 0x57c   :  { %v704_v17 = vmul.f32 %v693_v12, %v670_v44 }
 0x57d   :  { %v697_v13 = vmul.f32 0.5, %v696_v11 }
 0x57e   :  { %v707_v15 = vmul.f32 %v1728_v16, %v704_v17 }
 0x57f   :  { %v698_v14 = vsub.f32 1.5, %v697_v13 }
 0x580   :  { %v2159_v22 = vadd.f32 %v1729_v10, %v707_v15 }
 0x581   :  { %v699_v18 = vmul.f32 %v1776_v62, %v698_v14 }
 0x583   :  { %v703_v19 = vsel %vm702_vm13, %v1776_v62, %v699_v18 }
 0x584   :  { %v705_v20 = vmul.f32 %v703_v19, %v671_v48 }
 0x586   :  { %v708_v21 = vmul.f32 %v1728_v16, %v705_v20 }
 0x588   :  { %v2161_v23 = vadd.f32 %v1729_v10, %v708_v21 }
 0x58a   :  { %v714_v24 = vpack.c.bf16 %v2161_v23, %v2159_v22 }
 0x58c   :  { %1601 = vmatmul.msk.bf16.vlgmr.msra.gmra.mxu1 %vm87_vm0, %v714_v24 }
 0x609   :  { %v747_v39 = vpop.f32.mrf.mxu1 }
 0x60a   :  { %v748_v41 = vadd.f32 %v1731_v38, %v747_v39 }
 0x60c   :  { %v792_v2 = vpack.c.bf16 %v748_v41, %v748_v41 }
 0x60e   :  { %v915_v43 = vunpack.c.l.b16 %v792_v2  ;;  %1611 = vmatmul.msk.bf16.vlgmr.msrb.gmra.mxu3 %vm118_vm1, %v792_v2 }
 0x610   :  { %v916_v44 = vpack.c.b16 %v915_v43, %v915_v43 }
 0x611   :  { %v749_v45 = vpop.f32.mrf.mxu1 }
 0x612   :  { %v750_v3 = vadd.f32 %v1731_v38, %v749_v45  ;;  %1036 = vrot.lane.b32.xlu1 %v916_v44, %s1846_s5  ;;  %917 = vrot.lane.b32.xlu2 %v916_v44, %s1843_s3 }
 0x614   :  { %v793_v46 = vpack.c.bf16 %v750_v3, %v750_v3 }
 0x616   :  { %v941_v47 = vunpack.c.l.b16 %v793_v46  ;;  %1612 = vmatmul.msk.bf16.vlgmr.msrb.gmra.mxu0 %vm118_vm1, %v793_v46 }
 0x618   :  { %v942_v48 = vpack.c.b16 %v941_v47, %v941_v47 }
 0x61a   :  { %943 = vrot.lane.b32.xlu0 %v942_v48, %s1843_s3  ;;  %1177 = vrot.lane.b32.xlu1 %v2175_v37, %s1849_s0 }
 0x61b   :  { %1038 = vrot.lane.b32.xlu2 %v2170_v31, %s1846_s5 }
 0x622   :  { %1059 = vrot.lane.b32.xlu0 %v942_v48, %s1846_s5 }
 0x623   :  { %1061 = vrot.lane.b32.xlu2 %v2175_v37, %s1846_s5  ;;  %s2400_s5 = sld [smem:[#allocation8_spill]] }
 0x629   :  { %v790_v61 = vld [vmem:[%s2400_s5] sm:$0xff]  ;;  %v791_v4 = vld [vmem:[%s2400_s5 + $0x8] sm:$0xff] }
 0x62a   :  { %1152 = vrot.lane.b32.xlu0 %v916_v44, %s1849_s0  ;;  %vm796_vm14 = vcmp.eq.f32.partialorder %v790_v61, 0.0  ;;  %vm797_vm15 = vcmp.eq.f32.partialorder %v791_v4, 0.0 }
 0x62b   :  { %1154 = vrot.lane.b32.xlu2 %v2170_v31, %s1849_s0  ;;  %v798_v6 = vsel %vm796_vm14, -10000.0, %v1850_v40  ;;  %v2217_v8 = vsel %vm797_vm15, -10000.0, %v1850_v40 }
 0x632   :  { %893 = vrot.lane.b32.xlu0 %v2175_v37, %s1845_s27 }
 0x633   :  { %1175 = vrot.lane.b32.xlu2 %v942_v48, %s1849_s0 }
 0x66c   :  { %v918_v53 = vpop.permute.xlu2 %917 }
 0x66d   :  { %1615 = vmatmul.msk.bf16.vlgmr.msra.gmra.mxu3 %vm118_vm1, %v918_v53 }
 0x675   :  { %v1039_v54 = vpop.permute.xlu2 %1038 }
 0x676   :  { %v1044_v55 = vsel %vm118_vm1, %v1039_v54, 0 }
 0x677   :  { %1053 = vmatpush.bf16.xpose.msrb.mxu3 %v1044_v55 }
 0x67d   :  { %v1062_v56 = vpop.permute.xlu2 %1061 }
 0x67e   :  { %v1067_v57 = vsel %vm118_vm1, %v1062_v56, 0 }
 0x67f   :  { %1076 = vmatpush.bf16.xpose.msrb.mxu0 %v1067_v57 }
 0x684   :  { %v1037_v58 = vpop.permute.xlu1 %1036 }
 0x685   :  { %v1155_v59 = vpop.permute.xlu2 %1154  ;;  %1619 = vmatmul.msk.bf16.vlgmr.msrb.gmra.mxu3 %vm118_vm1, %v1037_v58 }
 0x686   :  { %v1160_v60 = vsel %vm118_vm1, %v1155_v59, 0 }
 0x687   :  { %1169 = vmatpush.bf16.xpose.msra.mxu3 %v1160_v60 }
 0x68c   :  { %v944_v63 = vpop.permute.xlu0 %943  ;;  %v1178_v0 = vpop.permute.xlu1 %1177 }
 0x68d   :  { %v1183_v1 = vsel %vm118_vm1, %v1178_v0, 0  ;;  %1616 = vmatmul.msk.bf16.vlgmr.msra.gmra.mxu0 %vm118_vm1, %v944_v63  ;;  %v1176_v15 = vpop.permute.xlu2 %1175 }
 0x68e   :  { %1192 = vmatpush.bf16.xpose.msra.mxu0 %v1183_v1 }
 0x691   :  { %v815_v5 = vpop.f32.mrf.mxu3 }
 0x692   :  { %v838_v7 = vmul.f32 0.35355338, %v815_v5 }
 0x693   :  { %v834_v62 = vpop.f32.mrf.mxu0 }
 0x694   :  { %v839_v9 = vmul.f32 0.35355338, %v834_v62  ;;  %v1060_v11 = vpop.permute.xlu0 %1059  ;;  %v840_v12 = vadd.f32 %v838_v7, %v798_v6 }
 0x696   :  { %v842_v13 = vsel %vm118_vm1, %v840_v12, -inf  ;;  %v841_v14 = vadd.f32 %v839_v9, %v2217_v8 }
 0x697   :  { %843 = vmax.xlane.f32.xlu0 %v842_v13 }
 0x698   :  { %v845_v16 = vsel %vm118_vm1, %v841_v14, -inf }
 0x699   :  { %846 = vmax.xlane.f32.xlu1 %v845_v16  ;;  %v817_v17 = vpop.f32.mrf.mxu3 }
 0x69b   :  { %v836_v18 = vpop.f32.mrf.mxu0 }
 0x69c   :  { %v1153_v19 = vpop.permute.xlu0 %1152 }
 0x69d   :  { %1620 = vmatmul.msk.bf16.vlgmr.msrb.gmra.mxu0 %vm118_vm1, %v1060_v11  ;;  %1623 = vmatmul.msk.bf16.vlgmr.msra.gmra.mxu3 %vm118_vm1, %v1153_v19 }
 0x6a4   :  { %v894_v40 = vpop.permute.xlu0 %893 }
 0x6a5   :  { %v899_v10 = vsel %vm195_vm4, %v894_v40, 0 }
 0x6a6   :  { %908 = vmatpush.bf16.msrb.mxu2 %v899_v10 }
 0x6ad   :  { %1624 = vmatmul.msk.bf16.vlgmr.msra.gmra.mxu0 %vm118_vm1, %v1176_v15 }
 0x6f0   :  { %v936_v20 = vpop.f32.mrf.mxu3 }
 0x6f1   :  { %v966_v21 = vmul.f32 0.35355338, %v936_v20 }
 0x6f3   :  { %v968_v24 = vadd.f32 %v966_v21, %v798_v6 }
 0x6f5   :  { %v970_v25 = vsel %vm118_vm1, %v968_v24, -inf }
 0x6f6   :  { %971 = vmax.xlane.f32.xlu1 %v970_v25 }
 0x6f8   :  { %v938_v26 = vpop.f32.mrf.mxu3 }
 0x708   :  { %v1055_v27 = vpop.f32.mrf.mxu3 }
 0x709   :  { %v1082_v38 = vmul.f32 0.35355338, %v1055_v27 }
 0x70a   :  { %v844_v28 = vpop.xlane.xlu0 %843  ;;  %v962_v29 = vpop.f32.mrf.mxu0 }
 0x70b   :  { %v848_v30 = vsub.f32 %v840_v12, %v844_v28  ;;  %v967_v32 = vmul.f32 0.35355338, %v962_v29  ;;  %v1084_v44 = vadd.f32 %v1082_v38, %v798_v6 }
 0x70c   :  { %v847_v33 = vpop.xlane.xlu1 %846 }
 0x70d   :  { %v850_v34 = vmul.f32 1.442695, %v848_v30  ;;  %v849_v35 = vsub.f32 %v841_v14, %v847_v33  ;;  %v969_v36 = vadd.f32 %v967_v32, %v2217_v8  ;;  %v1086_v47 = vsel %vm118_vm1, %v1084_v44, -inf }
 0x70f   :  { %1777 = vpow2.f32 %v850_v34  ;;  %v852_v39 = vmul.f32 1.442695, %v849_v35  ;;  %v973_v41 = vsel %vm118_vm1, %v969_v36, -inf }
 0x710   :  { %974 = vmax.xlane.f32.xlu2 %v973_v41  ;;  %v1057_v2 = vpop.f32.mrf.mxu3 }
 0x711   :  { %1779 = vpow2.f32 %v852_v39 }
 0x712   :  { %v964_v43 = vpop.f32.mrf.mxu0 }
 0x715   :  { %v2229_v45 = vpop.eup %1777 }
 0x716   :  { %v854_v3 = vsel %vm118_vm1, %v2229_v45, 0.0 }
 0x717   :  { %v1780_v46 = vpop.eup %1779  ;;  %855 = vadd.xlane.f32.xlu1 %v854_v3 }
 0x718   :  { %1087 = vmax.xlane.f32.xlu2 %v1086_v47  ;;  %v857_v48 = vsel %vm118_vm1, %v1780_v46, 0.0 }
 0x719   :  { %858 = vadd.xlane.f32.xlu0 %v857_v48 }
 0x71a   :  { %v1078_v49 = vpop.f32.mrf.mxu0 }
 0x71b   :  { %v1083_v50 = vmul.f32 0.35355338, %v1078_v49 }
 0x71d   :  { %v1085_v51 = vadd.f32 %v1083_v50, %v2217_v8 }
 0x71f   :  { %v1089_v52 = vsel %vm118_vm1, %v1085_v51, -inf }
 0x720   :  { %v1171_v53 = vpop.f32.mrf.mxu3 }
 0x721   :  { %v1198_v54 = vmul.f32 0.35355338, %v1171_v53  ;;  %1090 = vmax.xlane.f32.xlu0 %v1089_v52 }
 0x722   :  { %v1080_v55 = vpop.f32.mrf.mxu0 }
 0x723   :  { %v1200_v56 = vadd.f32 %v1198_v54, %v798_v6 }
 0x725   :  { %v1202_v57 = vsel %vm118_vm1, %v1200_v56, -inf }
 0x726   :  { %1203 = vmax.xlane.f32.xlu2 %v1202_v57 }
 0x728   :  { %v1173_v58 = vpop.f32.mrf.mxu3 }
 0x72a   :  { %v1194_v59 = vpop.f32.mrf.mxu0 }
 0x72b   :  { %v1199_v61 = vmul.f32 0.35355338, %v1194_v59 }
 0x72d   :  { %v2247_v63 = vadd.f32 %v1199_v61, %v2217_v8 }
 0x72f   :  { %v1205_v0 = vsel %vm118_vm1, %v2247_v63, -inf }
 0x730   :  { %994 = vrot.lane.b32.xlu1 %v2170_v31, %s1844_s26 }
 0x732   :  { %v1196_v60 = vpop.f32.mrf.mxu0 }
 0x735   :  { %1015 = vrot.lane.b32.xlu0 %v2175_v37, %s1844_s26  ;;  %s2401_s26 = smov 24  }
 0x738   :  { %1131 = vrot.lane.b32.xlu1 %v2175_v37, %s1847_s28 }
 0x73e   :  { %869 = vrot.lane.b32.xlu2 %v2170_v31, %s1845_s27 }
 0x762   :  { %1206 = vmax.xlane.f32.xlu1 %v1205_v0 }
 0x769   :  { %v972_v1 = vpop.xlane.xlu1 %971 }
 0x76a   :  { %v976_v4 = vsub.f32 %v968_v24, %v972_v1 }
 0x76c   :  { %v978_v5 = vmul.f32 1.442695, %v976_v4 }
 0x76e   :  { %1781 = vpow2.f32 %v978_v5 }
 0x774   :  { %v2251_v6 = vpop.eup %1781 }
 0x775   :  { %v982_v7 = vsel %vm118_vm1, %v2251_v6, 0.0 }
 0x776   :  { %983 = vadd.xlane.f32.xlu1 %v982_v7 }
 0x783   :  { %v975_v62 = vpop.xlane.xlu2 %974 }
 0x784   :  { %v977_v9 = vsub.f32 %v969_v36, %v975_v62 }
 0x786   :  { %v980_v11 = vmul.f32 1.442695, %v977_v9 }
 0x788   :  { %1783 = vpow2.f32 %v980_v11 }
 0x78a   :  { %v856_v19 = vpop.xlane.xlu1 %855 }
 0x78b   :  { %v1088_v8 = vpop.xlane.xlu2 %1087 }
 0x78c   :  { %v1092_v12 = vsub.f32 %v1084_v44, %v1088_v8  ;;  %v859_v13 = vpop.xlane.xlu0 %858 }
 0x78d   :  { %1785 = vrcp.f32 %v859_v13 }
 0x78e   :  { %v2255_v14 = vpop.eup %1783  ;;  %v1094_v16 = vmul.f32 1.442695, %v1092_v12 }
 0x78f   :  { %v985_v17 = vsel %vm118_vm1, %v2255_v14, 0.0 }
 0x790   :  { %1787 = vpow2.f32 %v1094_v16  ;;  %986 = vadd.xlane.f32.xlu1 %v985_v17 }
 0x791   :  { %1789 = vrcp.f32 %v856_v19 }
 0x793   :  { %v1786_v18 = vpop.eup %1785 }
 0x794   :  { %v863_v40 = vmul.f32 %v1786_v18, %v1780_v46  ;;  %v1091_v10 = vpop.xlane.xlu0 %1090 }
 0x795   :  { %v1093_v15 = vsub.f32 %v1085_v51, %v1091_v10 }
 0x796   :  { %v1788_v20 = vpop.eup %1787  ;;  %v865_v21 = vpack.c.bf16 %v863_v40, %v863_v40 }
 0x797   :  { %v1096_v24 = vmul.f32 1.442695, %v1093_v15  ;;  %v1098_v25 = vsel %vm118_vm1, %v1788_v20, 0.0  ;;  %v1790_v29 = vpop.eup %1789 }
 0x798   :  { %1099 = vadd.xlane.f32.xlu0 %v1098_v25  ;;  %1614 = vmatmul.msk.bf16.vlgmr.msrb.gmra.mxu2 %vm118_vm1, %v865_v21  ;;  %v862_v32 = vmul.f32 %v1790_v29, %v2229_v45 }
 0x799   :  { %1791 = vpow2.f32 %v1096_v24  ;;  %v1204_v26 = vpop.xlane.xlu2 %1203 }
 0x79a   :  { %v1208_v27 = vsub.f32 %v1200_v56, %v1204_v26  ;;  %v864_v39 = vpack.c.bf16 %v862_v32, %v862_v32 }
 0x79c   :  { %v1210_v28 = vmul.f32 1.442695, %v1208_v27 }
 0x79e   :  { %1793 = vpow2.f32 %v1210_v28 }
 0x79f   :  { %v1792_v30 = vpop.eup %1791 }
 0x7a0   :  { %v1101_v33 = vsel %vm118_vm1, %v1792_v30, 0.0 }
 0x7a1   :  { %v870_v34 = vpop.permute.xlu2 %869  ;;  %1102 = vadd.xlane.f32.xlu2 %v1101_v33 }
 0x7a2   :  { %v875_v35 = vsel %vm195_vm4, %v870_v34, 0  ;;  %v995_v36 = vpop.permute.xlu1 %994 }
 0x7a3   :  { %v1000_v38 = vsel %vm195_vm4, %v995_v36, 0  ;;  %884 = vmatpush.bf16.msrb.mxu1 %v875_v35 }
 0x7a4   :  { %v1794_v41 = vpop.eup %1793 }
 0x7a5   :  { %v1214_v44 = vsel %vm118_vm1, %v1794_v41, 0.0 }
 0x7a6   :  { %1613 = vmatmul.msk.bf16.vlgmr.msrb.gmra.mxu1 %vm118_vm1, %v864_v39 }
 0x7a7   :  { %1009 = vmatpush.bf16.msra.mxu1 %v1000_v38  ;;  %v1016_v2 = vpop.permute.xlu0 %1015  ;;  %v1671_v38 = vld [vmem:[%s2380_s12 + $0x8] sm:$0xff] }
 0x7a8   :  { %v1021_v43 = vsel %vm195_vm4, %v1016_v2, 0  ;;  %1328 = vmatpush.bf16.msrb.mxu3 %v1671_v38 }
 0x7a9   :  { %1215 = vadd.xlane.f32.xlu2 %v1214_v44  ;;  %1030 = vmatpush.bf16.msra.mxu2 %v1021_v43 }
 0x7aa   :  { %1110 = vrot.lane.b32.xlu1 %v2170_v31, %s1847_s28  ;;  %v1132_v45 = vpop.permute.xlu1 %1131 }
 0x7ab   :  { %v1137_v3 = vsel %vm195_vm4, %v1132_v45, 0 }
 0x7ac   :  { %1247 = vrot.lane.b32.xlu0 %v2175_v37, %s1848_s29 }
 0x7ad   :  { %1146 = vmatpush.bf16.msrb.mxu2 %v1137_v3 }
 0x7c1   :  { %1226 = vrot.lane.b32.xlu2 %v2170_v31, %s1848_s29  ;;  %s1859_s29 = smov [#allocation2]  }
 0x7c2   :  { %s1545_s23 = sshll.u32 %s1859_s29, 4  ;;  %s1546_s23 = int_to_ptr.vmem [resolvable:$true] %s1545_s23 }
 0x7d5   :  { %v1207_v46 = vpop.xlane.xlu1 %1206 }
 0x7d6   :  { %v1209_v47 = vsub.f32 %v2247_v63, %v1207_v46 }
 0x7d8   :  { %v1212_v48 = vmul.f32 1.442695, %v1209_v47 }
 0x7da   :  { %1795 = vpow2.f32 %v1212_v48 }
 0x7e0   :  { %v1796_v49 = vpop.eup %1795 }
 0x7e1   :  { %v1217_v50 = vsel %vm118_vm1, %v1796_v49, 0.0 }
 0x7e2   :  { %1218 = vadd.xlane.f32.xlu1 %v1217_v50 }
 0x7e9   :  { %v984_v51 = vpop.xlane.xlu1 %983 }
 0x7ea   :  { %1797 = vrcp.f32 %v984_v51 }
 0x7f0   :  { %v1798_v52 = vpop.eup %1797 }
 0x7f1   :  { %v990_v53 = vmul.f32 %v1798_v52, %v2251_v6 }
 0x7f3   :  { %v992_v54 = vpack.c.bf16 %v990_v53, %v990_v53 }
 0x7f5   :  { %1617 = vmatmul.msk.bf16.vlgmr.msra.gmra.mxu1 %vm118_vm1, %v992_v54 }
 0x803   :  { %v987_v37 = vpop.xlane.xlu1 %986 }
 0x804   :  { %1799 = vrcp.f32 %v987_v37 }
 0x80a   :  { %v1800_v31 = vpop.eup %1799 }
 0x80b   :  { %v991_v55 = vmul.f32 %v1800_v31, %v2255_v14  ;;  %v1100_v57 = vpop.xlane.xlu0 %1099 }
 0x80c   :  { %1801 = vrcp.f32 %v1100_v57 }
 0x80d   :  { %v993_v56 = vpack.c.bf16 %v991_v55, %v991_v55  ;;  %v1732_v55 = vld [vmem:[%s2381_s13] ss:$0 sm:$0xff]  ;;  %s1547_s13 = sshll.u32 %s2387_s19, 4  ;;  %s1548_s13 = int_to_ptr.hbm [resolvable:$true] %s1547_s13 }
 0x80f   :  { %1618 = vmatmul.msk.bf16.vlgmr.msra.gmra.mxu2 %vm118_vm1, %v993_v56 }
 0x812   :  { %v1802_v59 = vpop.eup %1801 }
 0x813   :  { %v1106_v61 = vmul.f32 %v1802_v59, %v1788_v20 }
 0x814   :  { %v1103_v58 = vpop.xlane.xlu2 %1102 }
 0x815   :  { %1803 = vrcp.f32 %v1103_v58  ;;  %v1108_v62 = vpack.c.bf16 %v1106_v61, %v1106_v61 }
 0x81b   :  { %v1804_v60 = vpop.eup %1803  ;;  %v910_v63 = vpop.f32.mrf.mxu2 }
 0x81c   :  { %v1107_v0 = vmul.f32 %v1804_v60, %v1792_v30  ;;  %v1111_v1 = vpop.permute.xlu1 %1110  ;;  %v1216_v4 = vpop.xlane.xlu2 %1215 }
 0x81d   :  { %v1116_v5 = vsel %vm195_vm4, %v1111_v1, 0  ;;  %1805 = vrcp.f32 %v1216_v4 }
 0x81e   :  { %v1109_v6 = vpack.c.bf16 %v1107_v0, %v1107_v0  ;;  %1125 = vmatpush.bf16.msrb.mxu1 %v1116_v5  ;;  %v1248_v7 = vpop.permute.xlu0 %1247 }
 0x81f   :  { %v1253_v9 = vsel %vm195_vm4, %v1248_v7, 0 }
 0x820   :  { %1622 = vmatmul.msk.bf16.vlgmr.msrb.gmra.mxu2 %vm118_vm1, %v1109_v6 }
 0x821   :  { %1621 = vmatmul.msk.bf16.vlgmr.msrb.gmra.mxu1 %vm118_vm1, %v1108_v62  ;;  %1262 = vmatpush.bf16.msra.mxu2 %v1253_v9 }
 0x823   :  { %v886_v11 = vpop.f32.mrf.mxu1  ;;  %v912_v8 = vpop.f32.mrf.mxu2 }
 0x824   :  { %v1227_v12 = vpop.permute.xlu2 %1226  ;;  %v1806_v14 = vpop.eup %1805 }
 0x825   :  { %v1232_v13 = vsel %vm195_vm4, %v1227_v12, 0  ;;  %v1222_v16 = vmul.f32 %v1806_v14, %v1794_v41  ;;  %v1670_v41 = vld [vmem:[%s2380_s12] sm:$0xff] }
 0x826   :  { %1241 = vmatpush.bf16.msra.mxu1 %v1232_v13  ;;  %1329 = vmatpush.bf16.msrb.mxu3 %v1670_v41 }
 0x827   :  { %v1224_v18 = vpack.c.bf16 %v1222_v16, %v1222_v16  ;;  %v1672_v16 = vld [vmem:[%s2382_s14] sm:$0xff] }
 0x82b   :  { %v888_v17 = vpop.f32.mrf.mxu1 }
 0x831   :  { %1625 = vmatmul.msk.bf16.vlgmr.msra.gmra.mxu1 %vm118_vm1, %v1224_v18 }
 0x855   :  { %v1219_v19 = vpop.xlane.xlu1 %1218 }
 0x856   :  { %1807 = vrcp.f32 %v1219_v19 }
 0x85c   :  { %v1808_v40 = vpop.eup %1807 }
 0x85d   :  { %v1223_v10 = vmul.f32 %v1808_v40, %v1796_v49 }
 0x85f   :  { %v1225_v15 = vpack.c.bf16 %v1223_v10, %v1223_v10 }
 0x861   :  { %1626 = vmatmul.msk.bf16.vlgmr.msra.gmra.mxu2 %vm118_vm1, %v1225_v15 }
 0x872   :  { %v1011_v20 = vpop.f32.mrf.mxu1 }
 0x87a   :  { %v1013_v21 = vpop.f32.mrf.mxu1 }
 0x892   :  { %v1032_v24 = vpop.f32.mrf.mxu2 }
 0x893   :  { %v1711_v25 = vpack.i.bf16 %v1032_v24, %v1011_v20 }
 0x895   :  { %1712 = vrot.lane.b32.xlu0 %v1711_v25, %s1855_s25 }
 0x89a   :  { %v1034_v26 = vpop.f32.mrf.mxu2 }
 0x89e   :  { %v1127_v27 = vpop.f32.mrf.mxu1 }
 0x8a3   :  { %v1148_v28 = vpop.f32.mrf.mxu2 }
 0x8a4   :  { %v1716_v29 = vpack.i.bf16 %v1148_v28, %v1127_v27 }
 0x8a6   :  { %v1129_v30 = vpop.f32.mrf.mxu1  ;;  %1717 = vrot.lane.b32.xlu2 %v1716_v29, %s1856_s30 }
 0x8ab   :  { %v1150_v32 = vpop.f32.mrf.mxu2 }
 0x8ac   :  { %v1733_v32 = vld [vmem:[%s2386_s18 + $0x2] ss:$0 sm:$0xff] }
 0x8ae   :  { %v1243_v33 = vpop.f32.mrf.mxu1 }
 0x8b6   :  { %v1245_v34 = vpop.f32.mrf.mxu1 }
 0x8e4   :  { %v1264_v35 = vpop.f32.mrf.mxu2 }
 0x8e5   :  { %v1721_v36 = vpack.i.bf16 %v1264_v35, %v1243_v33 }
 0x8e7   :  { %1722 = vrot.lane.b32.xlu0 %v1721_v36, %s2401_s26  ;;  %v1734_v36 = vld [vmem:[%s2386_s18 + $0x3] ss:$0 sm:$0xff] }
 0x8ec   :  { %v1266_v39 = vpop.f32.mrf.mxu2 }
 0x900   :  { %v1718_v45 = vpop.permute.xlu2 %1717 }
 0x901   :  { %v1720_v47 = vunpack.i.h.bf16 %v1718_v45  ;;  %v1719_v48 = vunpack.i.l.bf16 %v1718_v45  ;;  %v1677_v45 = vld [vmem:[%s2384_s16 + $0x18] sm:$0xff] }
 0x902   :  { %1475 = vmatpush.bf16.msrb.mxu1 %v1677_v45 }
 0x907   :  { %v1713_v2 = vpop.permute.xlu0 %1712 }
 0x908   :  { %v1715_v43 = vunpack.i.h.bf16 %v1713_v2  ;;  %v1714_v44 = vunpack.i.l.bf16 %v1713_v2 }
 0x90a   :  { %v1293_v3 = vsel %vm118_vm1, %v910_v63, %v1715_v43  ;;  %v1292_v46 = vsel %vm118_vm1, %v886_v11, %v1714_v44 }
 0x90b   :  { %v1294_v52 = vsel %vm607_vm5, %v1292_v46, %v1719_v48  ;;  %v1295_v53 = vsel %vm607_vm5, %v1293_v3, %v1720_v47  ;;  %v1676_v3 = vld [vmem:[%s2384_s16 + $0x10] sm:$0xff]  ;;  %v1675_v46 = vld [vmem:[%s2384_s16 + $0x8] sm:$0xff]  ;;  %v1674_v47 = vld [vmem:[%s2384_s16] sm:$0xff] }
 0x90c   :  { %1476 = vmatpush.bf16.msrb.mxu1 %v1676_v3 }
 0x910   :  { %1477 = vmatpush.bf16.msrb.mxu1 %v1675_v46 }
 0x914   :  { %1478 = vmatpush.bf16.msrb.mxu1 %v1674_v47 }
 0x959   :  { %v1723_v49 = vpop.permute.xlu0 %1722 }
 0x95a   :  { %v1725_v50 = vunpack.i.h.bf16 %v1723_v49  ;;  %v1724_v51 = vunpack.i.l.bf16 %v1723_v49  ;;  %v1735_v49 = vld [vmem:[%s2383_s15] ss:$0 sm:$0xff] }
 0x95c   :  { %v1297_v54 = vsel %vm610_vm6, %v1295_v53, %v1725_v50  ;;  %v1296_v37 = vsel %vm610_vm6, %v1294_v52, %v1724_v51 }
 0x95d   :  { %v1298_v31 = vpack.c.bf16 %v1297_v54, %v1296_v37 }
 0x95f   :  { %1635 = vmatmul.msk.bf16.vlgmr.msrb.gmra.mxu3 %vm87_vm0, %v1298_v31  ;;  %v1736_v31 = vld [vmem:[%s2385_s17] ss:$0 sm:$0xff] }
 0x9e2   :  { %v1331_v56 = vpop.f32.mrf.mxu3 }
 0x9e3   :  { %v1332_v57 = vadd.f32 %v1732_v55, %v1331_v56 }
 0x9e5   :  { %v1338_v58 = vadd.f32 %v1332_v57, %v2159_v22 }
 0x9e7   :  { %v1340_v59 = vsel %vm87_vm0, %v1338_v58, 0.0 }
 0x9e8   :  { %1341 = vadd.xlane.f32.xlu2 %v1340_v59 }
 0x9ea   :  { %v1333_v60 = vpop.f32.mrf.mxu3 }
 0x9eb   :  { %v1334_v61 = vadd.f32 %v1732_v55, %v1333_v60 }
 0x9ed   :  { %v1339_v63 = vadd.f32 %v1334_v61, %v2161_v23  ;;  %v1673_v23 = vld [vmem:[%s2382_s14 + $0x8] sm:$0xff] }
 0x9ee   :  { %1420 = vmatpush.bf16.msrb.mxu0 %v1673_v23 }
 0x9ef   :  { %v1343_v0 = vsel %vm87_vm0, %v1339_v63, 0.0 }
 0x9f0   :  { %1344 = vadd.xlane.f32.xlu0 %v1343_v0 }
 0x9f2   :  { %1421 = vmatpush.bf16.msrb.mxu0 %v1672_v16 }
 0xa5b   :  { %v1342_v1 = vpop.xlane.xlu2 %1341 }
 0xa5c   :  { %v1346_v4 = vmul.f32 %v1342_v1, %v2126_v42 }
 0xa5e   :  { %v1348_v5 = vsub.f32 %v1338_v58, %v1346_v4 }
 0xa60   :  { %v1350_v6 = vmul.f32 %v1348_v5, %v1348_v5 }
 0xa62   :  { %v1352_v7 = vsel %vm87_vm0, %v1350_v6, 0.0 }
 0xa63   :  { %v1345_v62 = vpop.xlane.xlu0 %1344  ;;  %1353 = vadd.xlane.f32.xlu1 %v1352_v7 }
 0xa64   :  { %v1347_v22 = vmul.f32 %v1345_v62, %v2126_v42 }
 0xa66   :  { %v1349_v9 = vsub.f32 %v1339_v63, %v1347_v22 }
 0xa68   :  { %v1351_v11 = vmul.f32 %v1349_v9, %v1349_v9 }
 0xa6a   :  { %v1355_v8 = vsel %vm87_vm0, %v1351_v11, 0.0 }
 0xa6b   :  { %1356 = vadd.xlane.f32.xlu1 %v1355_v8 }
 0xad6   :  { %v1354_v12 = vpop.xlane.xlu1 %1353 }
 0xad7   :  { %v1358_v13 = vmul.f32 %v1354_v12, %v2126_v42 }
 0xad9   :  { %v1360_v14 = vadd.f32 1e-05, %v1358_v13 }
 0xadb   :  { %1809 = vrsqrt.f32 %v1360_v14  ;;  %vm1368_vm2 = vweird.f32 %v1360_v14 }
 0xade   :  { %v1357_v17 = vpop.xlane.xlu1 %1356 }
 0xadf   :  { %v1359_v18 = vmul.f32 %v1357_v17, %v2126_v42 }
 0xae1   :  { %v1810_v19 = vpop.eup %1809  ;;  %v1361_v40 = vadd.f32 1e-05, %v1359_v18 }
 0xae2   :  { %v1363_v10 = vmul.f32 %v1810_v19, %v1360_v14  ;;  %vm1369_vm1 = vweird.f32 %v1810_v19 }
 0xae3   :  { %1811 = vrsqrt.f32 %v1361_v40  ;;  %vm1370_vm3 = vmor %vm1368_vm2, %vm1369_vm1  ;;  %vm1378_vm5 = vweird.f32 %v1361_v40 }
 0xae4   :  { %v1364_v15 = vmul.f32 %v1810_v19, %v1363_v10 }
 0xae6   :  { %v1365_v20 = vmul.f32 0.5, %v1364_v15 }
 0xae8   :  { %v1366_v21 = vsub.f32 1.5, %v1365_v20 }
 0xae9   :  { %v1812_v24 = vpop.eup %1811 }
 0xaea   :  { %v1367_v25 = vmul.f32 %v1810_v19, %v1366_v21  ;;  %v1373_v26 = vmul.f32 %v1812_v24, %v1361_v40  ;;  %vm1379_vm4 = vweird.f32 %v1812_v24 }
 0xaeb   :  { %vm1380_vm6 = vmor %vm1378_vm5, %vm1379_vm4 }
 0xaec   :  { %v1374_v27 = vmul.f32 %v1812_v24, %v1373_v26  ;;  %v1371_v28 = vsel %vm1370_vm3, %v1810_v19, %v1367_v25 }
 0xaed   :  { %v1382_v33 = vmul.f32 %v1371_v28, %v1348_v5 }
 0xaee   :  { %v1375_v29 = vmul.f32 0.5, %v1374_v27  ;;  %v1738_v27 = vld [vmem:[%s2386_s18 + $0x5] ss:$0 sm:$0xff] }
 0xaef   :  { %v1385_v38 = vmul.f32 %v1733_v32, %v1382_v33 }
 0xaf0   :  { %v1376_v30 = vsub.f32 1.5, %v1375_v29 }
 0xaf1   :  { %v1388_v2 = vadd.f32 %v1734_v36, %v1385_v38 }
 0xaf2   :  { %v1377_v34 = vmul.f32 %v1812_v24, %v1376_v30 }
 0xaf4   :  { %v1381_v35 = vsel %vm1380_vm6, %v1812_v24, %v1377_v34  ;;  %v1737_v24 = vld [vmem:[%s2386_s18 + $0x4] ss:$0 sm:$0xff]  ;;  %s1860_s18 = smov 128  }
 0xaf5   :  { %v1383_v39 = vmul.f32 %v1381_v35, %v1349_v9 }
 0xaf7   :  { %v1386_v41 = vmul.f32 %v1733_v32, %v1383_v39 }
 0xaf9   :  { %v1389_v43 = vadd.f32 %v1734_v36, %v1386_v41 }
 0xafb   :  { %v1390_v44 = vpack.c.bf16 %v1389_v43, %v1388_v2 }
 0xafd   :  { %1644 = vmatmul.msk.bf16.vlgmr.msrb.gmra.mxu0 %vm87_vm0, %v1390_v44 }
 0xb7a   :  { %v1423_v48 = vpop.f32.mrf.mxu0 }
 0xb7b   :  { %v1424_v50 = vadd.f32 %v1735_v49, %v1423_v48 }
 0xb7d   :  { %v1428_v53 = vmax.f32 %v1424_v50, 0.0 }
 0xb82   :  { %v1425_v51 = vpop.f32.mrf.mxu0 }
 0xb83   :  { %v1426_v52 = vadd.f32 %v1735_v49, %v1425_v51 }
 0xb85   :  { %v1429_v54 = vmax.f32 %v1426_v52, 0.0 }
 0xb87   :  { %v1430_v37 = vpack.c.bf16 %v1429_v54, %v1428_v53 }
 0xb89   :  { %1661 = vmatmul.msk.bf16.vlgmr.msrb.gmra.mxu1 %vm1467_vm7, %v1430_v37 }
 0xc06   :  { %v1480_v55 = vpop.f32.mrf.mxu1 }
 0xc07   :  { %v1481_v56 = vadd.f32 %v1736_v31, %v1480_v55 }
 0xc09   :  { %v1487_v57 = vadd.f32 %v1481_v56, %v1388_v2 }
 0xc0b   :  { %v1489_v58 = vsel %vm87_vm0, %v1487_v57, 0.0 }
 0xc0c   :  { %1490 = vadd.xlane.f32.xlu1 %v1489_v58 }
 0xc0e   :  { %v1482_v59 = vpop.f32.mrf.mxu1 }
 0xc0f   :  { %v1483_v60 = vadd.f32 %v1736_v31, %v1482_v59 }
 0xc11   :  { %v1488_v61 = vadd.f32 %v1483_v60, %v1389_v43 }
 0xc13   :  { %v1492_v63 = vsel %vm87_vm0, %v1488_v61, 0.0 }
 0xc14   :  { %1493 = vadd.xlane.f32.xlu1 %v1492_v63 }
 0xc7f   :  { %v1491_v0 = vpop.xlane.xlu1 %1490 }
 0xc80   :  { %v1495_v1 = vmul.f32 %v1491_v0, %v2126_v42 }
 0xc82   :  { %v1497_v4 = vsub.f32 %v1487_v57, %v1495_v1 }
 0xc84   :  { %v1499_v5 = vmul.f32 %v1497_v4, %v1497_v4 }
 0xc86   :  { %v1501_v6 = vsel %vm87_vm0, %v1499_v5, 0.0 }
 0xc87   :  { %1502 = vadd.xlane.f32.xlu1 %v1501_v6  ;;  %v1494_v7 = vpop.xlane.xlu1 %1493 }
 0xc88   :  { %v1496_v62 = vmul.f32 %v1494_v7, %v2126_v42 }
 0xc8a   :  { %v1498_v22 = vsub.f32 %v1488_v61, %v1496_v62 }
 0xc8c   :  { %v1500_v9 = vmul.f32 %v1498_v22, %v1498_v22 }
 0xc8e   :  { %v1504_v11 = vsel %vm87_vm0, %v1500_v9, 0.0 }
 0xc8f   :  { %1505 = vadd.xlane.f32.xlu1 %v1504_v11 }
 0xcfa   :  { %v1503_v8 = vpop.xlane.xlu1 %1502 }
 0xcfb   :  { %v1507_v23 = vmul.f32 %v1503_v8, %v2126_v42 }
 0xcfd   :  { %v1509_v12 = vadd.f32 1e-05, %v1507_v23 }
 0xcff   :  { %1813 = vrsqrt.f32 %v1509_v12  ;;  %vm1517_vm9 = vweird.f32 %v1509_v12 }
 0xd02   :  { %v1506_v13 = vpop.xlane.xlu1 %1505 }
 0xd03   :  { %v1508_v14 = vmul.f32 %v1506_v13, %v2126_v42 }
 0xd05   :  { %v1814_v16 = vpop.eup %1813  ;;  %v1510_v17 = vadd.f32 1e-05, %v1508_v14 }
 0xd06   :  { %v1512_v18 = vmul.f32 %v1814_v16, %v1509_v12  ;;  %vm1518_vm8 = vweird.f32 %v1814_v16 }
 0xd07   :  { %1815 = vrsqrt.f32 %v1510_v17  ;;  %vm1519_vm10 = vmor %vm1517_vm9, %vm1518_vm8  ;;  %vm1527_vm12 = vweird.f32 %v1510_v17 }
 0xd08   :  { %v1513_v19 = vmul.f32 %v1814_v16, %v1512_v18 }
 0xd0a   :  { %v1514_v40 = vmul.f32 0.5, %v1513_v19 }
 0xd0c   :  { %v1515_v10 = vsub.f32 1.5, %v1514_v40 }
 0xd0d   :  { %v1816_v15 = vpop.eup %1815 }
 0xd0e   :  { %v1516_v20 = vmul.f32 %v1814_v16, %v1515_v10  ;;  %v1522_v21 = vmul.f32 %v1816_v15, %v1510_v17  ;;  %vm1528_vm11 = vweird.f32 %v1816_v15 }
 0xd0f   :  { %vm1529_vm13 = vmor %vm1527_vm12, %vm1528_vm11 }
 0xd10   :  { %v1520_v25 = vsel %vm1519_vm10, %v1814_v16, %v1516_v20  ;;  %v1523_v26 = vmul.f32 %v1816_v15, %v1522_v21 }
 0xd11   :  { %v1531_v42 = vmul.f32 %v1520_v25, %v1497_v4 }
 0xd12   :  { %v1524_v28 = vmul.f32 0.5, %v1523_v26 }
 0xd13   :  { %v1534_v29 = vmul.f32 %v1737_v24, %v1531_v42 }
 0xd14   :  { %v1525_v30 = vsub.f32 1.5, %v1524_v28 }
 0xd15   :  { %v1537_v32 = vadd.f32 %v1738_v27, %v1534_v29 }
 0xd16   :  { %v1526_v33 = vmul.f32 %v1816_v15, %v1525_v30 }
 0xd17   :  { %1539 = vst.msk [vmem:[#allocation2] sm:$0xff] %vm87_vm0, %v1537_v32 }
 0xd18   :  { %v1530_v34 = vsel %vm1529_vm13, %v1816_v15, %v1526_v33 }
 0xd19   :  { %v1532_v35 = vmul.f32 %v1530_v34, %v1498_v22 }
 0xd1b   :  { %v1535_v36 = vmul.f32 %v1737_v24, %v1532_v35 }
 0xd1d   :  { %v1538_v38 = vadd.f32 %v1738_v27, %v1535_v36 }
 0xd1f   :  { %1540 = vst.msk [vmem:[#allocation2 + $0x8] sm:$0xff] %vm87_vm0, %v1538_v38 }
 0xd20   :  { %1553 = dma.vmem_to_hbm [thread:$0]  %s1546_s23, 256, %s1548_s13, [#allocation3], %s1860_s18, %s1860_s18, %s1855_s25  }
 0xd21   :  { %1841 = dma.done.wait [#allocation3], 256  }
 0xd22   :  { %1842 = vsyncadd [#allocation3], 4294967040 }
 0xd23   :  { %1558 = vsyncpa [#allocation3], 1 }

</bundles_post_ra>
